<compile_context>
chip_gen: v7x
topology: tpu7x:2x2x1
jax: 0.10.0
libtpu: 0.0.40
codegen_flags: <defaults>
</compile_context>

<pallas_src>
import functools

import jax
import jax.numpy as jnp
from jax.experimental import pallas as pl
from jax.experimental.pallas import tpu as pltpu


def _round_up(x, m):
    return (x + m - 1) // m * m


# ---------------------------------------------------------------------------
# Kernel 1: fused LightGCN forward
#   one invocation computes, for a 128-wide feature slab of E0:
#     E_final_slab = (1/(K+1)) * sum_{k=0..K} A_norm^k @ E0_slab
# ---------------------------------------------------------------------------
def _lightgcn_fused_kernel(adj_ref, e0_ref, out_ref, *, n_layers):
    a = adj_ref[...]                         # (N, N) normalized adjacency, VMEM-resident
    e = e0_ref[...].astype(jnp.float32)      # (N, TD) feature slab
    acc = e                                  # running layer sum (includes E^0)
    for _ in range(n_layers):                # static unroll: n_layers is a small Python int
        e = jnp.dot(a, e, preferred_element_type=jnp.float32)
        acc = acc + e
    out_ref[...] = (acc * (1.0 / (n_layers + 1))).astype(out_ref.dtype)


@functools.partial(jax.jit, static_argnames=("n_layers",))
def lightgcn_forward(adj_norm, ego_embeddings, n_layers):
    """E_final = mean over layers of A_norm^k @ E0, single fused pallas_call."""
    n, d = ego_embeddings.shape
    assert adj_norm.shape == (n, n), "adjacency must be (N, N)"

    td = 128                                  # lane-dense feature slab width
    dp = _round_up(d, td)                     # pad feature dim -> unmasked 128-lane stores
    e0 = ego_embeddings if dp == d else jnp.pad(ego_embeddings, ((0, 0), (0, dp - d)))

    out = pl.pallas_call(
        functools.partial(_lightgcn_fused_kernel, n_layers=n_layers),
        out_shape=jax.ShapeDtypeStruct((n, dp), ego_embeddings.dtype),
        grid_spec=pltpu.PrefetchScalarGridSpec(
            num_scalar_prefetch=0,
            grid=(dp // td,),                 # independent feature slabs
            in_specs=[
                pl.BlockSpec((n, n), lambda j: (0, 0)),   # A_norm: full, resident
                pl.BlockSpec((n, td), lambda j: (0, j)),  # E0 feature slab
            ],
            out_specs=pl.BlockSpec((n, td), lambda j: (0, j)),
        ),
        compiler_params=pltpu.CompilerParams(
            dimension_semantics=("parallel",),            # slabs are independent
        ),
    )(adj_norm, e0)
    return out if dp == d else out[:, :d]


# ---------------------------------------------------------------------------
# Kernel 2: predict(users, items) -> per-pair dot product
#   indices are scalar-prefetched into SMEM; the row gather from the full
#   user/item tables happens inside the kernel (no XLA gather round-trip),
#   scores are written lane-dense as (1, B).
# ---------------------------------------------------------------------------
def _predict_kernel(users_ref, items_ref, utab_ref, itab_ref, out_ref, u_scr, i_scr):
    b_sz = out_ref.shape[1]
    for b in range(b_sz):                     # static unroll; batch is small
        u_scr[pl.ds(b, 1), :] = utab_ref[pl.ds(users_ref[b], 1), :]
        i_scr[pl.ds(b, 1), :] = itab_ref[pl.ds(items_ref[b], 1), :]
    scores = jnp.sum(u_scr[...] * i_scr[...], axis=-1)    # (B,)
    out_ref[...] = scores.reshape(1, b_sz)                 # scores on lanes


@jax.jit
def pallas_predict(users, items, user_emb, item_emb):
    b = users.shape[0]
    nu, d = user_emb.shape
    ni, d2 = item_emb.shape
    assert d == d2
    out = pl.pallas_call(
        _predict_kernel,
        out_shape=jax.ShapeDtypeStruct((1, b), jnp.float32),
        grid_spec=pltpu.PrefetchScalarGridSpec(
            num_scalar_prefetch=2,            # users, items -> SMEM, visible in-kernel
            grid=(1,),
            in_specs=[
                pl.BlockSpec((nu, d), lambda g, *pf: (0, 0)),
                pl.BlockSpec((ni, d), lambda g, *pf: (0, 0)),
            ],
            out_specs=pl.BlockSpec((1, b), lambda g, *pf: (0, 0)),
            scratch_shapes=[
                pltpu.VMEM((b, d), jnp.float32),
                pltpu.VMEM((b, d), jnp.float32),
            ],
        ),
    )(users, items, user_emb, item_emb)
    return out[0]


# ---------------------------------------------------------------------------
# Parameter setup (plain JAX, not a hot path)
# ---------------------------------------------------------------------------
def build_normalized_adjacency(key, n_users, n_items):
    """Dense symmetric-normalized bipartite adjacency A_hat = D^-1/2 A D^-1/2."""
    n = n_users + n_items
    r = (jax.random.uniform(key, (n_users, n_items)) < 0.05).astype(jnp.float32)
    adj = jnp.zeros((n, n), dtype=jnp.float32)
    adj = adj.at[:n_users, n_users:].set(r)
    adj = adj.at[n_users:, :n_users].set(r.T)
    deg = jnp.sum(adj, axis=1)
    d_inv_sqrt = jnp.where(deg > 0, 1.0 / jnp.sqrt(deg), 0.0)
    return adj * d_inv_sqrt[:, None] * d_inv_sqrt[None, :]


if __name__ == "__main__":
    key = jax.random.PRNGKey(0)
    k_adj, k_emb, k_u, k_i = jax.random.split(key, 4)

    # small config consistent with a LightGCN model
    n_users, n_items, embed_dim, n_layers = 128, 128, 64, 3
    n_nodes = n_users + n_items  # 256

    adj_norm = build_normalized_adjacency(k_adj, n_users, n_items)          # (256, 256)
    ego = 0.1 * jax.random.normal(k_emb, (n_nodes, embed_dim), dtype=jnp.float32)

    # forward: all K propagation layers + layer mean in one fused Pallas kernel
    all_emb = lightgcn_forward(adj_norm, ego, n_layers)
    user_all, item_all = all_emb[:n_users], all_emb[n_users:]

    # predict(users, items): fused in-kernel gather + dot product
    batch = 8
    users = jax.random.randint(k_u, (batch,), 0, n_users)
    items = jax.random.randint(k_i, (batch,), 0, n_items)
    scores = pallas_predict(users, items, user_all, item_all)

    jax.block_until_ready(scores)

    # reference check against plain JAX
    ref_embs = [ego]
    e = ego
    for _ in range(n_layers):
        e = adj_norm @ e
        ref_embs.append(e)
    ref_all = jnp.mean(jnp.stack(ref_embs, 0), 0)
    ref_scores = jnp.sum(ref_all[:n_users][users] * ref_all[n_users:][items], -1)

    assert jnp.allclose(all_emb, ref_all, atol=1e-4, rtol=1e-4)
    assert jnp.allclose(scores, ref_scores, atol=1e-4, rtol=1e-4)

    print("KERNEL_OK")
</pallas_src>

<mosaic_0001>
module attributes {stable_mosaic.version = 11 : i64} {
  func.func @_lightgcn_fused_kernel(%arg0: i32, %arg1: memref<256x256xf32, #tpu.memory_space<vmem>>, %arg2: memref<256x128xf32, #tpu.memory_space<vmem>>, %arg3: memref<256x128xf32, #tpu.memory_space<vmem>>) attributes {dimension_semantics = [#tpu.dimension_semantics<parallel>], iteration_bounds = array<i64: 1>, scalar_prefetch = 0 : i64, scratch_operands = 0 : i64, tpu.core_type = #tpu.core_type<tc>, window_params = [{pipeline_mode = #tpu.pipeline_mode<synchronous>, transform_indices = @transform_0, window_bounds = array<i64: 256, 256>}, {transform_indices = @transform_1, window_bounds = array<i64: 256, 128>}, {transform_indices = @transform_2, window_bounds = array<i64: 256, 128>}]} {
    %c0 = arith.constant 0 : index
    %c0_0 = arith.constant 0 : index
    %0 = vector.load %arg1[%c0, %c0_0] : memref<256x256xf32, #tpu.memory_space<vmem>>, vector<256x256xf32>
    %c0_1 = arith.constant 0 : index
    %c0_2 = arith.constant 0 : index
    %1 = vector.load %arg2[%c0_1, %c0_2] : memref<256x128xf32, #tpu.memory_space<vmem>>, vector<256x128xf32>
    %cst = arith.constant dense<0.000000e+00> : vector<256x128xf32>
    %2 = tpu.matmul %0, %1, %cst {dimension_numbers = #tpu.dot_dimension_numbers<[1], [0], [0], [1], [0, 0, 1, 1], [], []>} : vector<256x256xf32>, vector<256x128xf32>, vector<256x128xf32> -> vector<256x128xf32>
    %3 = arith.addf %1, %2 : vector<256x128xf32>
    %cst_3 = arith.constant dense<0.000000e+00> : vector<256x128xf32>
    %4 = tpu.matmul %0, %2, %cst_3 {dimension_numbers = #tpu.dot_dimension_numbers<[1], [0], [0], [1], [0, 0, 1, 1], [], []>} : vector<256x256xf32>, vector<256x128xf32>, vector<256x128xf32> -> vector<256x128xf32>
    %5 = arith.addf %3, %4 : vector<256x128xf32>
    %cst_4 = arith.constant dense<0.000000e+00> : vector<256x128xf32>
    %6 = tpu.matmul %0, %4, %cst_4 {dimension_numbers = #tpu.dot_dimension_numbers<[1], [0], [0], [1], [0, 0, 1, 1], [], []>} : vector<256x256xf32>, vector<256x128xf32>, vector<256x128xf32> -> vector<256x128xf32>
    %7 = arith.addf %5, %6 : vector<256x128xf32>
    %cst_5 = arith.constant 2.500000e-01 : f32
    %8 = vector.broadcast %cst_5 : f32 to vector<256x128xf32>
    %9 = arith.mulf %7, %8 : vector<256x128xf32>
    %c0_6 = arith.constant 0 : index
    %c0_7 = arith.constant 0 : index
    %10 = vector.load %arg3[%c0_6, %c0_7] : memref<256x128xf32, #tpu.memory_space<vmem>>, vector<256x128xf32>
    tpu.vector_store %arg3[%c0_6, %c0_7], %9 {strides = array<i32>} : memref<256x128xf32, #tpu.memory_space<vmem>>, vector<256x128xf32>,
    return
  }
  func.func @transform_0(%arg0: i32) -> (i32, i32) {
    %c0_i32 = arith.constant 0 : i32
    %c0_i32_0 = arith.constant 0 : i32
    %c0_i32_1 = arith.constant 0 : i32
    return %c0_i32, %c0_i32_0 : i32, i32
  }
  func.func @transform_1(%arg0: i32) -> (i32, i32) {
    %c0_i32 = arith.constant 0 : i32
    %c0_i32_0 = arith.constant 0 : i32
    return %c0_i32, %arg0 : i32, i32
  }
  func.func @transform_2(%arg0: i32) -> (i32, i32) {
    %c0_i32 = arith.constant 0 : i32
    %c0_i32_0 = arith.constant 0 : i32
    return %c0_i32, %arg0 : i32, i32
  }
}

</mosaic_0001>

<bundles_post_ra>
// kernel: lightgcn_forward.1
= control target key start
LH: loop header
LB: loop body
LE: loop exit
PB: predicated region body
PF: predicated region fallthrough
CT: control target
= control target key end

     0   :  { %v2274_v0 = vmov 0.0|0.0   ;;  %s2271_s1 = inlined_call_operand.vmem [shape: f32[256,128], index: 1, kind: input, shape index: {}]   ;;  %s2272_s0 = inlined_call_operand.vmem [shape: f32[256,256], index: 0, kind: input, shape index: {}]   ;;  %s2273_s2 = inlined_call_operand.vmem [shape: f32[256,128], index: 2, kind: output, shape index: {}]  }
   0x1   :  { %946 = vmatprep.subr.bf16.mxu0 %v2274_v0  ;;  %v1144_v1 = vld [vmem:[%s2271_s1] sm:$0xff]  ;;  %v1149_v2 = vld [vmem:[%s2271_s1 + $0x8] sm:$0xff]  ;;  %v1154_v3 = vld [vmem:[%s2271_s1 + $0x10] sm:$0xff]  ;;  %1090 = vmatprep.subr.bf16.mxu1 %v2274_v0 }
   0x2   :  { %2380 = vst [vmem:[#allocation2_spill] sm:$0xff] %v1144_v1  ;;  %2381 = vst [vmem:[#allocation3_spill] sm:$0xff] %v1149_v2  ;;  %v947_v4 = vpack.c.bf16 %v1149_v2, %v1144_v1  ;;  %v1162_v5 = vld [vmem:[%s2271_s1 + $0x18] sm:$0xff]  ;;  %v1170_v7 = vld [vmem:[%s2271_s1 + $0x20] sm:$0xff] }
   0x3   :  { %2382 = vst [vmem:[#allocation4_spill] sm:$0xff] %v1154_v3  ;;  %2383 = vst [vmem:[#allocation5_spill] sm:$0xff] %v1162_v5  ;;  %v950_v6 = vpack.c.bf16 %v1162_v5, %v1154_v3  ;;  %v1175_v8 = vld [vmem:[%s2271_s1 + $0x28] sm:$0xff]  ;;  %v1184_v10 = vld [vmem:[%s2271_s1 + $0x30] sm:$0xff] }
   0x4   :  { %948 = vmatpush1.bf16.msra.mxu0 %v947_v4  ;;  %1106 = vmatpush1.bf16.msra.mxu1 %v947_v4  ;;  %2384 = vst [vmem:[#allocation6_spill] sm:$0xff] %v1170_v7  ;;  %2385 = vst [vmem:[#allocation7_spill] sm:$0xff] %v1175_v8  ;;  %v953_v9 = vpack.c.bf16 %v1175_v8, %v1170_v7  ;;  %v1189_v11 = vld [vmem:[%s2271_s1 + $0x38] sm:$0xff]  ;;  %v1195_v12 = vld [vmem:[%s2272_s0 + $0x8] sm:$0xff] }
   0x5   :  { %949 = vmatprep.subr.bf16.mxu0 %v2274_v0  ;;  %1091 = vmatprep.subr.bf16.mxu1 %v2274_v0  ;;  %2386 = vst [vmem:[#allocation8_spill] sm:$0xff] %v1184_v10  ;;  %2387 = vst [vmem:[#allocation9_spill] sm:$0xff] %v1189_v11  ;;  %v956_v13 = vpack.c.bf16 %v1189_v11, %v1184_v10  ;;  %v1203_v14 = vld [vmem:[%s2271_s1 + $0x40] sm:$0xff]  ;;  %v1208_v15 = vld [vmem:[%s2271_s1 + $0x48] sm:$0xff] }
   0x6   :  { %2388 = vst [vmem:[#allocation10_spill] sm:$0xff] %v1203_v14  ;;  %2389 = vst [vmem:[#allocation11_spill] sm:$0xff] %v1208_v15  ;;  %171 = vmatprep.mubr.f32.mxu0 %v1195_v12  ;;  %v959_v16 = vpack.c.bf16 %v1208_v15, %v1203_v14  ;;  %v1217_v17 = vld [vmem:[%s2272_s0 + $0x108] sm:$0xff]  ;;  %v1223_v18 = vld [vmem:[%s2271_s1 + $0x50] sm:$0xff] }
   0x7   :  { %2390 = vst [vmem:[#allocation12_spill] sm:$0xff] %v1223_v18  ;;  %v1228_v19 = vld [vmem:[%s2271_s1 + $0x58] sm:$0xff]  ;;  %251 = vmatprep.mubr.f32.mxu1 %v1217_v17  ;;  %v1238_v21 = vld [vmem:[%s2271_s1 + $0x60] sm:$0xff]  ;;  %v1243_v22 = vld [vmem:[%s2271_s1 + $0x68] sm:$0xff] }
   0x8   :  { %951 = vmatpush1.bf16.msra.mxu0 %v950_v6  ;;  %1107 = vmatpush1.bf16.msra.mxu1 %v950_v6  ;;  %2391 = vst [vmem:[#allocation13_spill] sm:$0xff] %v1228_v19  ;;  %v962_v20 = vpack.c.bf16 %v1228_v19, %v1223_v18  ;;  %2392 = vst [vmem:[#allocation14_spill] sm:$0xff] %v1238_v21  ;;  %v965_v23 = vpack.c.bf16 %v1243_v22, %v1238_v21  ;;  %v1252_v24 = vld [vmem:[%s2271_s1 + $0x70] sm:$0xff]  ;;  %v1257_v25 = vld [vmem:[%s2271_s1 + $0x78] sm:$0xff] }
   0x9   :  { %952 = vmatprep.subr.bf16.mxu0 %v2274_v0  ;;  %1092 = vmatprep.subr.bf16.mxu1 %v2274_v0  ;;  %2393 = vst [vmem:[#allocation15_spill] sm:$0xff] %v1243_v22  ;;  %2394 = vst [vmem:[#allocation16_spill] sm:$0xff] %v1252_v24  ;;  %v968_v26 = vpack.c.bf16 %v1257_v25, %v1252_v24  ;;  %v1266_v27 = vld [vmem:[%s2271_s1 + $0x80] sm:$0xff]  ;;  %v1271_v28 = vld [vmem:[%s2271_s1 + $0x88] sm:$0xff] }
   0xa   :  { %2395 = vst [vmem:[#allocation17_spill] sm:$0xff] %v1257_v25  ;;  %2396 = vst [vmem:[#allocation18_spill] sm:$0xff] %v1266_v27  ;;  %v971_v29 = vpack.c.bf16 %v1271_v28, %v1266_v27  ;;  %v1280_v30 = vld [vmem:[%s2271_s1 + $0x90] sm:$0xff]  ;;  %v1285_v31 = vld [vmem:[%s2271_s1 + $0x98] sm:$0xff] }
   0xb   :  { %2397 = vst [vmem:[#allocation19_spill] sm:$0xff] %v1271_v28  ;;  %2398 = vst [vmem:[#allocation20_spill] sm:$0xff] %v1280_v30  ;;  %v974_v32 = vpack.c.bf16 %v1285_v31, %v1280_v30  ;;  %v1294_v33 = vld [vmem:[%s2271_s1 + $0xa0] sm:$0xff]  ;;  %v1299_v34 = vld [vmem:[%s2271_s1 + $0xa8] sm:$0xff] }
   0xc   :  { %954 = vmatpush1.bf16.msra.mxu0 %v953_v9  ;;  %1108 = vmatpush1.bf16.msra.mxu1 %v953_v9  ;;  %2399 = vst [vmem:[#allocation21_spill] sm:$0xff] %v1285_v31  ;;  %2400 = vst [vmem:[#allocation22_spill] sm:$0xff] %v1294_v33  ;;  %v977_v35 = vpack.c.bf16 %v1299_v34, %v1294_v33  ;;  %v1308_v36 = vld [vmem:[%s2271_s1 + $0xb0] sm:$0xff]  ;;  %v1313_v37 = vld [vmem:[%s2271_s1 + $0xb8] sm:$0xff] }
   0xd   :  { %955 = vmatprep.subr.bf16.mxu0 %v2274_v0  ;;  %1093 = vmatprep.subr.bf16.mxu1 %v2274_v0  ;;  %2401 = vst [vmem:[#allocation23_spill] sm:$0xff] %v1299_v34  ;;  %2402 = vst [vmem:[#allocation24_spill] sm:$0xff] %v1308_v36  ;;  %v980_v38 = vpack.c.bf16 %v1313_v37, %v1308_v36  ;;  %v1322_v39 = vld [vmem:[%s2271_s1 + $0xc0] sm:$0xff]  ;;  %v1327_v40 = vld [vmem:[%s2271_s1 + $0xc8] sm:$0xff] }
   0xe   :  { %2403 = vst [vmem:[#allocation25_spill] sm:$0xff] %v1313_v37  ;;  %2404 = vst [vmem:[#allocation26_spill] sm:$0xff] %v1322_v39  ;;  %v983_v41 = vpack.c.bf16 %v1327_v40, %v1322_v39  ;;  %v1336_v42 = vld [vmem:[%s2271_s1 + $0xd0] sm:$0xff]  ;;  %v1341_v43 = vld [vmem:[%s2271_s1 + $0xd8] sm:$0xff] }
   0xf   :  { %2405 = vst [vmem:[#allocation27_spill] sm:$0xff] %v1327_v40  ;;  %2406 = vst [vmem:[#allocation28_spill] sm:$0xff] %v1336_v42  ;;  %v986_v44 = vpack.c.bf16 %v1341_v43, %v1336_v42  ;;  %v1350_v45 = vld [vmem:[%s2271_s1 + $0xe0] sm:$0xff]  ;;  %v1355_v46 = vld [vmem:[%s2271_s1 + $0xe8] sm:$0xff] }
  0x10   :  { %957 = vmatpush1.bf16.msra.mxu0 %v956_v13  ;;  %1109 = vmatpush1.bf16.msra.mxu1 %v956_v13  ;;  %2407 = vst [vmem:[#allocation29_spill] sm:$0xff] %v1341_v43  ;;  %2408 = vst [vmem:[#allocation30_spill] sm:$0xff] %v1350_v45  ;;  %v989_v47 = vpack.c.bf16 %v1355_v46, %v1350_v45  ;;  %v1364_v48 = vld [vmem:[%s2271_s1 + $0xf0] sm:$0xff]  ;;  %v1369_v49 = vld [vmem:[%s2271_s1 + $0xf8] sm:$0xff] }
  0x11   :  { %958 = vmatprep.subr.bf16.mxu0 %v2274_v0  ;;  %1094 = vmatprep.subr.bf16.mxu1 %v2274_v0  ;;  %2409 = vst [vmem:[#allocation31_spill] sm:$0xff] %v1355_v46  ;;  %2410 = vst [vmem:[#allocation32_spill] sm:$0xff] %v1364_v48  ;;  %v992_v50 = vpack.c.bf16 %v1369_v49, %v1364_v48  ;;  %v1379_v51 = vld [vmem:[%s2272_s0] sm:$0xff]  ;;  %v1389_v53 = vld [vmem:[%s2272_s0 + $0x18] sm:$0xff] }
  0x12   :  { %2411 = vst [vmem:[#allocation33_spill] sm:$0xff] %v1369_v49  ;;  %v1384_v52 = vld [vmem:[%s2272_s0 + $0x100] sm:$0xff]  ;;  %v1394_v54 = vld [vmem:[%s2272_s0 + $0x118] sm:$0xff]  ;;  %v1404_v55 = vld [vmem:[%s2272_s0 + $0x10] sm:$0xff] }
  0x13   :  { %v1410_v56 = vld [vmem:[%s2272_s0 + $0x110] sm:$0xff]  ;;  %v1415_v57 = vld [vmem:[%s2272_s0 + $0x28] sm:$0xff]  ;;  %v1428_v59 = vld [vmem:[%s2272_s0 + $0x20] sm:$0xff] }
  0x14   :  { %960 = vmatpush1.bf16.msra.mxu0 %v959_v16  ;;  %1110 = vmatpush1.bf16.msra.mxu1 %v959_v16  ;;  %2412 = vst [vmem:[#allocation34_spill] sm:$0xff] %v1410_v56  ;;  %v1420_v58 = vld [vmem:[%s2272_s0 + $0x128] sm:$0xff]  ;;  %v1434_v60 = vld [vmem:[%s2272_s0 + $0x120] sm:$0xff]  ;;  %v1439_v61 = vld [vmem:[%s2272_s0 + $0x38] sm:$0xff] }
  0x15   :  { %961 = vmatprep.subr.bf16.mxu0 %v2274_v0  ;;  %1095 = vmatprep.subr.bf16.mxu1 %v2274_v0  ;;  %2413 = vst [vmem:[#allocation35_spill] sm:$0xff] %v1420_v58  ;;  %2414 = vst [vmem:[#allocation36_spill] sm:$0xff] %v1434_v60  ;;  %v1444_v62 = vld [vmem:[%s2272_s0 + $0x138] sm:$0xff]  ;;  %v1452_v63 = vld [vmem:[%s2272_s0 + $0x30] sm:$0xff] }
  0x16   :  { %2415 = vst [vmem:[#allocation37_spill] sm:$0xff] %v1444_v62  ;;  %v1458_v4 = vld [vmem:[%s2272_s0 + $0x130] sm:$0xff]  ;;  %v1463_v6 = vld [vmem:[%s2272_s0 + $0x48] sm:$0xff]  ;;  %v1476_v13 = vld [vmem:[%s2272_s0 + $0x40] sm:$0xff] }
  0x17   :  { %2416 = vst [vmem:[#allocation38_spill] sm:$0xff] %v1458_v4  ;;  %v1468_v9 = vld [vmem:[%s2272_s0 + $0x148] sm:$0xff]  ;;  %v1482_v16 = vld [vmem:[%s2272_s0 + $0x140] sm:$0xff]  ;;  %v1583_v43 = vld [vmem:[%s2272_s0 + $0x98] sm:$0xff] }
  0x18   :  { %963 = vmatpush1.bf16.msra.mxu0 %v962_v20  ;;  %1111 = vmatpush1.bf16.msra.mxu1 %v962_v20  ;;  %2417 = vst [vmem:[#allocation39_spill] sm:$0xff] %v1468_v9  ;;  %2418 = vst [vmem:[#allocation40_spill] sm:$0xff] %v1482_v16  ;;  %v1487_v20 = vld [vmem:[%s2272_s0 + $0x58] sm:$0xff]  ;;  %v1559_v49 = vld [vmem:[%s2272_s0 + $0x88] sm:$0xff] }
  0x19   :  { %964 = vmatprep.subr.bf16.mxu0 %v2274_v0  ;;  %1096 = vmatprep.subr.bf16.mxu1 %v2274_v0  ;;  %v1564_v48 = vld [vmem:[%s2272_s0 + $0x188] sm:$0xff]  ;;  %v1572_v46 = vld [vmem:[%s2272_s0 + $0x80] sm:$0xff]  ;;  %v1588_v42 = vld [vmem:[%s2272_s0 + $0x198] sm:$0xff] }
  0x1a   :  { %2425 = vst [vmem:[#allocation47_spill] sm:$0xff] %v1564_v48  ;;  %v1578_v45 = vld [vmem:[%s2272_s0 + $0x180] sm:$0xff]  ;;  %2427 = vst [vmem:[#allocation49_spill] sm:$0xff] %v1588_v42  ;;  %v1596_v40 = vld [vmem:[%s2272_s0 + $0x90] sm:$0xff] }
  0x1b   :  { %2426 = vst [vmem:[#allocation48_spill] sm:$0xff] %v1578_v45  ;;  %v1602_v39 = vld [vmem:[%s2272_s0 + $0x190] sm:$0xff]  ;;  %v1607_v37 = vld [vmem:[%s2272_s0 + $0xa8] sm:$0xff]  ;;  %v1620_v34 = vld [vmem:[%s2272_s0 + $0xa0] sm:$0xff] }
  0x1c   :  { %966 = vmatpush1.bf16.msra.mxu0 %v965_v23  ;;  %1112 = vmatpush1.bf16.msra.mxu1 %v965_v23  ;;  %v1492_v23 = vld [vmem:[%s2272_s0 + $0x158] sm:$0xff]  ;;  %2428 = vst [vmem:[#allocation50_spill] sm:$0xff] %v1602_v39  ;;  %v1612_v36 = vld [vmem:[%s2272_s0 + $0x1a8] sm:$0xff]  ;;  %v1626_v33 = vld [vmem:[%s2272_s0 + $0x1a0] sm:$0xff] }
  0x1d   :  { %967 = vmatprep.subr.bf16.mxu0 %v2274_v0  ;;  %1097 = vmatprep.subr.bf16.mxu1 %v2274_v0  ;;  %2419 = vst [vmem:[#allocation41_spill] sm:$0xff] %v1492_v23  ;;  %2429 = vst [vmem:[#allocation51_spill] sm:$0xff] %v1612_v36  ;;  %v1631_v31 = vld [vmem:[%s2272_s0 + $0xb8] sm:$0xff]  ;;  %v1644_v28 = vld [vmem:[%s2272_s0 + $0xb0] sm:$0xff] }
  0x1e   :  { %2430 = vst [vmem:[#allocation52_spill] sm:$0xff] %v1626_v33  ;;  %v1636_v30 = vld [vmem:[%s2272_s0 + $0x1b8] sm:$0xff]  ;;  %v1650_v27 = vld [vmem:[%s2272_s0 + $0x1b0] sm:$0xff]  ;;  %v1655_v25 = vld [vmem:[%s2272_s0 + $0xc8] sm:$0xff] }
  0x1f   :  { %2431 = vst [vmem:[#allocation53_spill] sm:$0xff] %v1636_v30  ;;  %2432 = vst [vmem:[#allocation54_spill] sm:$0xff] %v1650_v27  ;;  %v1660_v24 = vld [vmem:[%s2272_s0 + $0x1c8] sm:$0xff]  ;;  %v1668_v22 = vld [vmem:[%s2272_s0 + $0xc0] sm:$0xff] }
  0x20   :  { %969 = vmatpush1.bf16.msra.mxu0 %v968_v26  ;;  %1113 = vmatpush1.bf16.msra.mxu1 %v968_v26  ;;  %v1500_v26 = vld [vmem:[%s2272_s0 + $0x50] sm:$0xff]  ;;  %2433 = vst [vmem:[#allocation55_spill] sm:$0xff] %v1660_v24  ;;  %v1674_v21 = vld [vmem:[%s2272_s0 + $0x1c0] sm:$0xff]  ;;  %v1679_v19 = vld [vmem:[%s2272_s0 + $0xd8] sm:$0xff] }
  0x21   :  { %970 = vmatprep.subr.bf16.mxu0 %v2274_v0  ;;  %1098 = vmatprep.subr.bf16.mxu1 %v2274_v0  ;;  %2434 = vst [vmem:[#allocation56_spill] sm:$0xff] %v1674_v21  ;;  %v1684_v18 = vld [vmem:[%s2272_s0 + $0x1d8] sm:$0xff]  ;;  %v1692_v15 = vld [vmem:[%s2272_s0 + $0xd0] sm:$0xff]  ;;  %v1703_v11 = vld [vmem:[%s2272_s0 + $0xe8] sm:$0xff] }
  0x22   :  { %2435 = vst [vmem:[#allocation57_spill] sm:$0xff] %v1684_v18  ;;  %v1698_v14 = vld [vmem:[%s2272_s0 + $0x1d0] sm:$0xff]  ;;  %v1708_v10 = vld [vmem:[%s2272_s0 + $0x1e8] sm:$0xff]  ;;  %v1716_v8 = vld [vmem:[%s2272_s0 + $0xe0] sm:$0xff] }
  0x23   :  { %2436 = vst [vmem:[#allocation58_spill] sm:$0xff] %v1698_v14  ;;  %2437 = vst [vmem:[#allocation59_spill] sm:$0xff] %v1708_v10  ;;  %v1722_v7 = vld [vmem:[%s2272_s0 + $0x1e0] sm:$0xff]  ;;  %v1727_v5 = vld [vmem:[%s2272_s0 + $0xf8] sm:$0xff] }
  0x24   :  { %972 = vmatpush1.bf16.msra.mxu0 %v971_v29  ;;  %1114 = vmatpush1.bf16.msra.mxu1 %v971_v29  ;;  %v1506_v29 = vld [vmem:[%s2272_s0 + $0x150] sm:$0xff]  ;;  %2438 = vst [vmem:[#allocation60_spill] sm:$0xff] %v1722_v7  ;;  %v1732_v3 = vld [vmem:[%s2272_s0 + $0x1f8] sm:$0xff] }
  0x25   :  { %973 = vmatprep.subr.bf16.mxu0 %v2274_v0  ;;  %1099 = vmatprep.subr.bf16.mxu1 %v2274_v0  ;;  %2420 = vst [vmem:[#allocation42_spill] sm:$0xff] %v1506_v29  ;;  %2439 = vst [vmem:[#allocation61_spill] sm:$0xff] %v1732_v3  ;;  %v1740_v2 = vld [vmem:[%s2272_s0 + $0xf0] sm:$0xff] }
  0x26   :  { %v1746_v1 = vld [vmem:[%s2272_s0 + $0x1f0] sm:$0xff] }
  0x27   :  { %2440 = vst [vmem:[#allocation62_spill] sm:$0xff] %v1746_v1 }
  0x28   :  { %975 = vmatpush1.bf16.msra.mxu0 %v974_v32  ;;  %1115 = vmatpush1.bf16.msra.mxu1 %v974_v32  ;;  %v1511_v32 = vld [vmem:[%s2272_s0 + $0x68] sm:$0xff] }
  0x29   :  { %976 = vmatprep.subr.bf16.mxu0 %v2274_v0  ;;  %1100 = vmatprep.subr.bf16.mxu1 %v2274_v0 }
  0x2c   :  { %978 = vmatpush1.bf16.msra.mxu0 %v977_v35  ;;  %1116 = vmatpush1.bf16.msra.mxu1 %v977_v35  ;;  %v1516_v35 = vld [vmem:[%s2272_s0 + $0x168] sm:$0xff] }
  0x2d   :  { %979 = vmatprep.subr.bf16.mxu0 %v2274_v0  ;;  %1101 = vmatprep.subr.bf16.mxu1 %v2274_v0  ;;  %2421 = vst [vmem:[#allocation43_spill] sm:$0xff] %v1516_v35 }
  0x30   :  { %981 = vmatpush1.bf16.msra.mxu0 %v980_v38  ;;  %1117 = vmatpush1.bf16.msra.mxu1 %v980_v38  ;;  %v1524_v38 = vld [vmem:[%s2272_s0 + $0x60] sm:$0xff] }
  0x31   :  { %982 = vmatprep.subr.bf16.mxu0 %v2274_v0  ;;  %1102 = vmatprep.subr.bf16.mxu1 %v2274_v0 }
  0x34   :  { %984 = vmatpush1.bf16.msra.mxu0 %v983_v41  ;;  %1118 = vmatpush1.bf16.msra.mxu1 %v983_v41  ;;  %v1530_v41 = vld [vmem:[%s2272_s0 + $0x160] sm:$0xff] }
  0x35   :  { %985 = vmatprep.subr.bf16.mxu0 %v2274_v0  ;;  %1103 = vmatprep.subr.bf16.mxu1 %v2274_v0  ;;  %2422 = vst [vmem:[#allocation44_spill] sm:$0xff] %v1530_v41 }
  0x38   :  { %987 = vmatpush1.bf16.msra.mxu0 %v986_v44  ;;  %1119 = vmatpush1.bf16.msra.mxu1 %v986_v44  ;;  %v1535_v44 = vld [vmem:[%s2272_s0 + $0x78] sm:$0xff] }
  0x39   :  { %988 = vmatprep.subr.bf16.mxu0 %v2274_v0  ;;  %1104 = vmatprep.subr.bf16.mxu1 %v2274_v0 }
  0x3c   :  { %990 = vmatpush1.bf16.msra.mxu0 %v989_v47  ;;  %1120 = vmatpush1.bf16.msra.mxu1 %v989_v47  ;;  %v1540_v47 = vld [vmem:[%s2272_s0 + $0x178] sm:$0xff] }
  0x3d   :  { %991 = vmatprep.subr.bf16.mxu0 %v2274_v0  ;;  %1105 = vmatprep.subr.bf16.mxu1 %v2274_v0  ;;  %2423 = vst [vmem:[#allocation45_spill] sm:$0xff] %v1540_v47 }
  0x40   :  { %993 = vmatpush1.bf16.msra.mxu0 %v992_v50  ;;  %1121 = vmatpush1.bf16.msra.mxu1 %v992_v50  ;;  %v1548_v50 = vld [vmem:[%s2272_s0 + $0x70] sm:$0xff] }
  0x41   :  { %994 = vmatprep.subr.bf16.mxu1 %v2274_v0  ;;  %1042 = vmatprep.subr.bf16.mxu0 %v2274_v0  ;;  %v1554_v0 = vld [vmem:[%s2272_s0 + $0x170] sm:$0xff] }
  0x42   :  { %2424 = vst [vmem:[#allocation46_spill] sm:$0xff] %v1554_v0 }
  0x43   :  { %172 = vmatmul.mubr.f32.vlgmr.msra.gmra.mrb[0].mxu0 %v1379_v51  ;;  %252 = vmatmul.mubr.f32.vlgmr.msra.gmra.mrb[0].mxu1 %v1384_v52 }
  0x44   :  { %176 = vmatprep.mubr.f32.mxu0 %v1389_v53  ;;  %256 = vmatprep.mubr.f32.mxu1 %v1394_v54 }
  0x47   :  { %177 = vmatmul.mubr.f32.gmra.mrb[2].mxu0 %v1404_v55  ;;  %257 = vmatmul.mubr.f32.gmra.mrb[2].mxu1 %v1410_v56 }
  0x48   :  { %181 = vmatprep.mubr.f32.mxu0 %v1415_v57  ;;  %261 = vmatprep.mubr.f32.mxu1 %v1420_v58 }
  0x4b   :  { %182 = vmatmul.mubr.f32.gmra.mrb[4].mxu0 %v1428_v59  ;;  %262 = vmatmul.mubr.f32.gmra.mrb[4].mxu1 %v1434_v60 }
  0x4c   :  { %186 = vmatprep.mubr.f32.mxu0 %v1439_v61  ;;  %266 = vmatprep.mubr.f32.mxu1 %v1444_v62 }
  0x4f   :  { %187 = vmatmul.mubr.f32.gmra.mrb[6].mxu0 %v1452_v63  ;;  %267 = vmatmul.mubr.f32.gmra.mrb[6].mxu1 %v1458_v4 }
  0x50   :  { %191 = vmatprep.mubr.f32.mxu0 %v1463_v6  ;;  %271 = vmatprep.mubr.f32.mxu1 %v1468_v9 }
  0x53   :  { %192 = vmatmul.mubr.f32.gmra.mrb[8].mxu0 %v1476_v13  ;;  %272 = vmatmul.mubr.f32.gmra.mrb[8].mxu1 %v1482_v16 }
  0x54   :  { %196 = vmatprep.mubr.f32.mxu0 %v1487_v20  ;;  %276 = vmatprep.mubr.f32.mxu1 %v1492_v23 }
  0x57   :  { %197 = vmatmul.mubr.f32.gmra.mrb[10].mxu0 %v1500_v26  ;;  %277 = vmatmul.mubr.f32.gmra.mrb[10].mxu1 %v1506_v29 }
  0x58   :  { %201 = vmatprep.mubr.f32.mxu0 %v1511_v32  ;;  %281 = vmatprep.mubr.f32.mxu1 %v1516_v35 }
  0x5b   :  { %202 = vmatmul.mubr.f32.gmra.mrb[12].mxu0 %v1524_v38  ;;  %282 = vmatmul.mubr.f32.gmra.mrb[12].mxu1 %v1530_v41 }
  0x5c   :  { %206 = vmatprep.mubr.f32.mxu0 %v1535_v44  ;;  %286 = vmatprep.mubr.f32.mxu1 %v1540_v47 }
  0x5f   :  { %207 = vmatmul.mubr.f32.gmra.mrb[14].mxu0 %v1548_v50  ;;  %287 = vmatmul.mubr.f32.gmra.mrb[14].mxu1 %v1554_v0 }
  0x60   :  { %211 = vmatprep.mubr.f32.mxu0 %v1559_v49  ;;  %291 = vmatprep.mubr.f32.mxu1 %v1564_v48 }
  0x63   :  { %212 = vmatmul.mubr.f32.gmra.mrb[16].mxu0 %v1572_v46  ;;  %292 = vmatmul.mubr.f32.gmra.mrb[16].mxu1 %v1578_v45 }
  0x64   :  { %216 = vmatprep.mubr.f32.mxu0 %v1583_v43  ;;  %296 = vmatprep.mubr.f32.mxu1 %v1588_v42 }
  0x67   :  { %217 = vmatmul.mubr.f32.gmra.mrb[18].mxu0 %v1596_v40  ;;  %297 = vmatmul.mubr.f32.gmra.mrb[18].mxu1 %v1602_v39 }
  0x68   :  { %221 = vmatprep.mubr.f32.mxu0 %v1607_v37  ;;  %301 = vmatprep.mubr.f32.mxu1 %v1612_v36 }
  0x6b   :  { %222 = vmatmul.mubr.f32.gmra.mrb[20].mxu0 %v1620_v34  ;;  %302 = vmatmul.mubr.f32.gmra.mrb[20].mxu1 %v1626_v33  ;;  %v2444_v33 = vmov 0.0|0.0  }
  0x6c   :  { %226 = vmatprep.mubr.f32.mxu0 %v1631_v31  ;;  %306 = vmatprep.mubr.f32.mxu1 %v1636_v30 }
  0x6f   :  { %227 = vmatmul.mubr.f32.gmra.mrb[22].mxu0 %v1644_v28  ;;  %307 = vmatmul.mubr.f32.gmra.mrb[22].mxu1 %v1650_v27 }
  0x70   :  { %231 = vmatprep.mubr.f32.mxu0 %v1655_v25  ;;  %311 = vmatprep.mubr.f32.mxu1 %v1660_v24 }
  0x73   :  { %232 = vmatmul.mubr.f32.gmra.mrb[24].mxu0 %v1668_v22  ;;  %312 = vmatmul.mubr.f32.gmra.mrb[24].mxu1 %v1674_v21 }
  0x74   :  { %236 = vmatprep.mubr.f32.mxu0 %v1679_v19  ;;  %316 = vmatprep.mubr.f32.mxu1 %v1684_v18 }
  0x77   :  { %237 = vmatmul.mubr.f32.gmra.mrb[26].mxu0 %v1692_v15  ;;  %317 = vmatmul.mubr.f32.gmra.mrb[26].mxu1 %v1698_v14 }
  0x78   :  { %241 = vmatprep.mubr.f32.mxu0 %v1703_v11  ;;  %321 = vmatprep.mubr.f32.mxu1 %v1708_v10 }
  0x7b   :  { %242 = vmatmul.mubr.f32.gmra.mrb[28].mxu0 %v1716_v8  ;;  %322 = vmatmul.mubr.f32.gmra.mrb[28].mxu1 %v1722_v7 }
  0x7c   :  { %246 = vmatprep.mubr.f32.mxu0 %v1727_v5  ;;  %326 = vmatprep.mubr.f32.mxu1 %v1732_v3 }
  0x7f   :  { %247 = vmatmul.mubr.f32.gmra.mrb[30].mxu0 %v1740_v2  ;;  %327 = vmatmul.mubr.f32.gmra.mrb[30].mxu1 %v1746_v1 }
  0x80   :  { %428 = vmatprep.mubr.f32.mxu1 %v1195_v12  ;;  %685 = vmatprep.mubr.f32.mxu0 %v1195_v12 }
 0x116   :  { %v1752_v7 = vpop.f32.mrb[0].mxu0  ;;  %v1754_v10 = vpop.f32.mrb[0].mxu1 }
 0x117   :  { %2441 = vst [vmem:[#allocation63_spill] sm:$0xff] %v1752_v7  ;;  %v175_v14 = vpop.f32.mrb[1].mxu0  ;;  %v255_v18 = vpop.f32.mrb[1].mxu1 }
 0x11a   :  { %v1756_v3 = vpop.f32.mrb[2].mxu0  ;;  %v1758_v21 = vpop.f32.mrb[2].mxu1 }
 0x11b   :  { %2442 = vst [vmem:[#allocation64_spill] sm:$0xff] %v1756_v3  ;;  %v995_v24 = vpack.c.bf16 %v1756_v3, %v1752_v7  ;;  %v180_v27 = vpop.f32.mrb[3].mxu0  ;;  %v260_v30 = vpop.f32.mrb[3].mxu1 }
 0x11d   :  { %996 = vmatpush1.bf16.msra.mxu1 %v995_v24 }
 0x11e   :  { %v1764_v12 = vpop.f32.mrb[4].mxu0  ;;  %997 = vmatprep.subr.bf16.mxu1 %v2444_v33  ;;  %v1767_v36 = vpop.f32.mrb[4].mxu1 }
 0x11f   :  { %2443 = vst [vmem:[#allocation65_spill] sm:$0xff] %v1764_v12  ;;  %v185_v14 = vpop.f32.mrb[5].mxu0  ;;  %v265_v18 = vpop.f32.mrb[5].mxu1 }
 0x122   :  { %v1769_v39 = vpop.f32.mrb[6].mxu0  ;;  %v1771_v42 = vpop.f32.mrb[6].mxu1 }
 0x123   :  { %2445 = vst [vmem:[#allocation66_spill] sm:$0xff] %v1769_v39  ;;  %v998_v27 = vpack.c.bf16 %v1769_v39, %v1764_v12  ;;  %v190_v3 = vpop.f32.mrb[7].mxu0  ;;  %v270_v24 = vpop.f32.mrb[7].mxu1 }
 0x125   :  { %999 = vmatpush1.bf16.msra.mxu1 %v998_v27 }
 0x126   :  { %v1777_v1 = vpop.f32.mrb[8].mxu0  ;;  %1000 = vmatprep.subr.bf16.mxu1 %v2444_v33  ;;  %v1780_v7 = vpop.f32.mrb[8].mxu1 }
 0x127   :  { %2446 = vst [vmem:[#allocation67_spill] sm:$0xff] %v1777_v1  ;;  %v195_v14 = vpop.f32.mrb[9].mxu0  ;;  %v275_v18 = vpop.f32.mrb[9].mxu1 }
 0x12a   :  { %v1782_v45 = vpop.f32.mrb[10].mxu0  ;;  %v1784_v48 = vpop.f32.mrb[10].mxu1 }
 0x12b   :  { %2447 = vst [vmem:[#allocation68_spill] sm:$0xff] %v1782_v45  ;;  %v1001_v3 = vpack.c.bf16 %v1782_v45, %v1777_v1  ;;  %v200_v39 = vpop.f32.mrb[11].mxu0  ;;  %v280_v27 = vpop.f32.mrb[11].mxu1 }
 0x12d   :  { %1002 = vmatpush1.bf16.msra.mxu1 %v1001_v3 }
 0x12e   :  { %v1790_v30 = vpop.f32.mrb[12].mxu0  ;;  %1003 = vmatprep.subr.bf16.mxu1 %v2444_v33  ;;  %v1793_v12 = vpop.f32.mrb[12].mxu1 }
 0x12f   :  { %2448 = vst [vmem:[#allocation69_spill] sm:$0xff] %v1790_v30  ;;  %2449 = vst [vmem:[#allocation70_spill] sm:$0xff] %v1793_v12  ;;  %v205_v14 = vpop.f32.mrb[13].mxu0  ;;  %v285_v18 = vpop.f32.mrb[13].mxu1 }
 0x132   :  { %v1795_v0 = vpop.f32.mrb[14].mxu0  ;;  %v1797_v47 = vpop.f32.mrb[14].mxu1 }
 0x133   :  { %2450 = vst [vmem:[#allocation71_spill] sm:$0xff] %v1795_v0  ;;  %2451 = vst [vmem:[#allocation72_spill] sm:$0xff] %v1797_v47  ;;  %v1004_v39 = vpack.c.bf16 %v1795_v0, %v1790_v30  ;;  %v210_v45 = vpop.f32.mrb[15].mxu0  ;;  %v1028_v27 = vpack.c.bf16 %v1797_v47, %v1793_v12  ;;  %v290_v3 = vpop.f32.mrb[15].mxu1 }
 0x135   :  { %1005 = vmatpush1.bf16.msra.mxu1 %v1004_v39 }
 0x136   :  { %v1803_v24 = vpop.f32.mrb[16].mxu0  ;;  %1006 = vmatprep.subr.bf16.mxu1 %v2444_v33  ;;  %v1806_v1 = vpop.f32.mrb[16].mxu1 }
 0x137   :  { %2452 = vst [vmem:[#allocation73_spill] sm:$0xff] %v1803_v24  ;;  %2453 = vst [vmem:[#allocation74_spill] sm:$0xff] %v1806_v1  ;;  %v215_v14 = vpop.f32.mrb[17].mxu0  ;;  %v295_v18 = vpop.f32.mrb[17].mxu1 }
 0x13a   :  { %v1808_v41 = vpop.f32.mrb[18].mxu0  ;;  %v1810_v35 = vpop.f32.mrb[18].mxu1 }
 0x13b   :  { %2454 = vst [vmem:[#allocation75_spill] sm:$0xff] %v1808_v41  ;;  %2455 = vst [vmem:[#allocation76_spill] sm:$0xff] %v1810_v35  ;;  %v1007_v45 = vpack.c.bf16 %v1808_v41, %v1803_v24  ;;  %v220_v0 = vpop.f32.mrb[19].mxu0  ;;  %v1031_v3 = vpack.c.bf16 %v1810_v35, %v1806_v1  ;;  %v300_v39 = vpop.f32.mrb[19].mxu1 }
 0x13d   :  { %1008 = vmatpush1.bf16.msra.mxu1 %v1007_v45 }
 0x13e   :  { %v1816_v47 = vpop.f32.mrb[20].mxu0  ;;  %1009 = vmatprep.subr.bf16.mxu1 %v2444_v33  ;;  %v1819_v12 = vpop.f32.mrb[20].mxu1 }
 0x13f   :  { %2456 = vst [vmem:[#allocation77_spill] sm:$0xff] %v1816_v47  ;;  %2457 = vst [vmem:[#allocation78_spill] sm:$0xff] %v1819_v12  ;;  %v225_v14 = vpop.f32.mrb[21].mxu0  ;;  %v305_v18 = vpop.f32.mrb[21].mxu1 }
 0x142   :  { %v1821_v30 = vpop.f32.mrb[22].mxu0  ;;  %v1823_v29 = vpop.f32.mrb[22].mxu1 }
 0x143   :  { %2458 = vst [vmem:[#allocation79_spill] sm:$0xff] %v1821_v30  ;;  %2459 = vst [vmem:[#allocation80_spill] sm:$0xff] %v1823_v29  ;;  %v1010_v0 = vpack.c.bf16 %v1821_v30, %v1816_v47  ;;  %v230_v41 = vpop.f32.mrb[23].mxu0  ;;  %v1034_v39 = vpack.c.bf16 %v1823_v29, %v1819_v12  ;;  %v310_v45 = vpop.f32.mrb[23].mxu1 }
 0x145   :  { %1011 = vmatpush1.bf16.msra.mxu1 %v1010_v0 }
 0x146   :  { %v1829_v35 = vpop.f32.mrb[24].mxu0  ;;  %1012 = vmatprep.subr.bf16.mxu1 %v2444_v33  ;;  %v1832_v1 = vpop.f32.mrb[24].mxu1 }
 0x147   :  { %v235_v14 = vpop.f32.mrb[25].mxu0  ;;  %v315_v18 = vpop.f32.mrb[25].mxu1 }
 0x14a   :  { %v1834_v24 = vpop.f32.mrb[26].mxu0  ;;  %v1836_v23 = vpop.f32.mrb[26].mxu1 }
 0x14b   :  { %2460 = vst [vmem:[#allocation81_spill] sm:$0xff] %v1834_v24  ;;  %2461 = vst [vmem:[#allocation82_spill] sm:$0xff] %v1836_v23  ;;  %v1013_v41 = vpack.c.bf16 %v1834_v24, %v1829_v35  ;;  %v240_v30 = vpop.f32.mrb[27].mxu0  ;;  %v1037_v45 = vpack.c.bf16 %v1836_v23, %v1832_v1  ;;  %v320_v0 = vpop.f32.mrb[27].mxu1  ;;  %v2462_v23 = vpack.c.bf16 %v1758_v21, %v1754_v10 }
 0x14d   :  { %1014 = vmatpush1.bf16.msra.mxu1 %v1013_v41 }
 0x14e   :  { %v1842_v29 = vpop.f32.mrb[28].mxu0  ;;  %1015 = vmatprep.subr.bf16.mxu1 %v2444_v33  ;;  %v1845_v12 = vpop.f32.mrb[28].mxu1 }
 0x14f   :  { %v245_v14 = vpop.f32.mrb[29].mxu0  ;;  %v325_v18 = vpop.f32.mrb[29].mxu1 }
 0x150   :  { %v2463_v14 = vpack.c.bf16 %v1771_v42, %v1767_v36  ;;  %v2471_v18 = vld [vmem:[#allocation46_spill] sm:$0xff] }
 0x152   :  { %v1847_v47 = vpop.f32.mrb[30].mxu0  ;;  %v1849_v16 = vpop.f32.mrb[30].mxu1 }
 0x153   :  { %v1016_v30 = vpack.c.bf16 %v1847_v47, %v1842_v29  ;;  %v250_v24 = vpop.f32.mrb[31].mxu0  ;;  %v1040_v0 = vpack.c.bf16 %v1849_v16, %v1845_v12  ;;  %v330_v41 = vpop.f32.mrb[31].mxu1 }
 0x154   :  { %v2464_v24 = vpack.c.bf16 %v1784_v48, %v1780_v7  ;;  %v2474_v41 = vld [vmem:[#allocation49_spill] sm:$0xff] }
 0x155   :  { %1017 = vmatpush1.bf16.msra.mxu1 %v1016_v30  ;;  %v2472_v30 = vld [vmem:[#allocation47_spill] sm:$0xff] }
 0x156   :  { %1018 = vmatprep.subr.bf16.mxu1 %v2444_v33 }
 0x159   :  { %1020 = vmatpush1.bf16.msra.mxu1 %v2462_v23  ;;  %v2465_v23 = vld [vmem:[#allocation40_spill] sm:$0xff] }
 0x15a   :  { %1021 = vmatprep.subr.bf16.mxu1 %v2444_v33 }
 0x15d   :  { %1023 = vmatpush1.bf16.msra.mxu1 %v2463_v14  ;;  %v2475_v14 = vld [vmem:[#allocation50_spill] sm:$0xff] }
 0x15e   :  { %1024 = vmatprep.subr.bf16.mxu1 %v2444_v33 }
 0x161   :  { %1026 = vmatpush1.bf16.msra.mxu1 %v2464_v24  ;;  %v2476_v24 = vld [vmem:[#allocation51_spill] sm:$0xff] }
 0x162   :  { %1027 = vmatprep.subr.bf16.mxu1 %v2444_v33 }
 0x165   :  { %1029 = vmatpush1.bf16.msra.mxu1 %v1028_v27  ;;  %v2466_v27 = vld [vmem:[#allocation41_spill] sm:$0xff] }
 0x166   :  { %1030 = vmatprep.subr.bf16.mxu1 %v2444_v33 }
 0x169   :  { %1032 = vmatpush1.bf16.msra.mxu1 %v1031_v3  ;;  %v2468_v3 = vld [vmem:[#allocation43_spill] sm:$0xff] }
 0x16a   :  { %1033 = vmatprep.subr.bf16.mxu1 %v2444_v33 }
 0x16d   :  { %1035 = vmatpush1.bf16.msra.mxu1 %v1034_v39  ;;  %v2469_v39 = vld [vmem:[#allocation44_spill] sm:$0xff] }
 0x16e   :  { %1036 = vmatprep.subr.bf16.mxu1 %v2444_v33 }
 0x171   :  { %1038 = vmatpush1.bf16.msra.mxu1 %v1037_v45  ;;  %v2470_v45 = vld [vmem:[#allocation45_spill] sm:$0xff] }
 0x172   :  { %1039 = vmatprep.subr.bf16.mxu1 %v2444_v33 }
 0x175   :  { %1041 = vmatpush1.bf16.msra.mxu1 %v1040_v0  ;;  %v2473_v0 = vld [vmem:[#allocation48_spill] sm:$0xff] }
 0x178   :  { %429 = vmatmul.mubr.f32.vlgmr.msra.gmra.mrb[32].mxu1 %v1379_v51 }
 0x179   :  { %433 = vmatprep.mubr.f32.mxu1 %v1389_v53 }
 0x17c   :  { %434 = vmatmul.mubr.f32.gmra.mrb[34].mxu1 %v1404_v55 }
 0x17d   :  { %438 = vmatprep.mubr.f32.mxu1 %v1415_v57 }
 0x180   :  { %439 = vmatmul.mubr.f32.gmra.mrb[36].mxu1 %v1428_v59 }
 0x181   :  { %443 = vmatprep.mubr.f32.mxu1 %v1439_v61 }
 0x184   :  { %444 = vmatmul.mubr.f32.gmra.mrb[38].mxu1 %v1452_v63 }
 0x185   :  { %448 = vmatprep.mubr.f32.mxu1 %v1463_v6 }
 0x188   :  { %449 = vmatmul.mubr.f32.gmra.mrb[40].mxu1 %v1476_v13 }
 0x189   :  { %453 = vmatprep.mubr.f32.mxu1 %v1487_v20 }
 0x18c   :  { %454 = vmatmul.mubr.f32.gmra.mrb[42].mxu1 %v1500_v26 }
 0x18d   :  { %458 = vmatprep.mubr.f32.mxu1 %v1511_v32 }
 0x190   :  { %459 = vmatmul.mubr.f32.gmra.mrb[44].mxu1 %v1524_v38 }
 0x191   :  { %463 = vmatprep.mubr.f32.mxu1 %v1535_v44 }
 0x194   :  { %464 = vmatmul.mubr.f32.gmra.mrb[46].mxu1 %v1548_v50 }
 0x195   :  { %468 = vmatprep.mubr.f32.mxu1 %v1559_v49 }
 0x198   :  { %469 = vmatmul.mubr.f32.gmra.mrb[48].mxu1 %v1572_v46 }
 0x199   :  { %473 = vmatprep.mubr.f32.mxu1 %v1583_v43 }
 0x19c   :  { %474 = vmatmul.mubr.f32.gmra.mrb[50].mxu1 %v1596_v40 }
 0x19d   :  { %478 = vmatprep.mubr.f32.mxu1 %v1607_v37 }
 0x1a0   :  { %479 = vmatmul.mubr.f32.gmra.mrb[52].mxu1 %v1620_v34 }
 0x1a1   :  { %483 = vmatprep.mubr.f32.mxu1 %v1631_v31 }
 0x1a4   :  { %484 = vmatmul.mubr.f32.gmra.mrb[54].mxu1 %v1644_v28 }
 0x1a5   :  { %488 = vmatprep.mubr.f32.mxu1 %v1655_v25 }
 0x1a8   :  { %489 = vmatmul.mubr.f32.gmra.mrb[56].mxu1 %v1668_v22 }
 0x1a9   :  { %493 = vmatprep.mubr.f32.mxu1 %v1679_v19 }
 0x1ac   :  { %494 = vmatmul.mubr.f32.gmra.mrb[58].mxu1 %v1692_v15 }
 0x1ad   :  { %498 = vmatprep.mubr.f32.mxu1 %v1703_v11 }
 0x1b0   :  { %499 = vmatmul.mubr.f32.gmra.mrb[60].mxu1 %v1716_v8 }
 0x1b1   :  { %503 = vmatprep.mubr.f32.mxu1 %v1727_v5 }
 0x1b4   :  { %504 = vmatmul.mubr.f32.gmra.mrb[62].mxu1 %v1740_v2 }
 0x1b5   :  { %508 = vmatprep.mubr.f32.mxu1 %v1217_v17  ;;  %v2467_v17 = vld [vmem:[#allocation42_spill] sm:$0xff] }
 0x1b8   :  { %509 = vmatmul.mubr.f32.gmra.mrb[64].mxu1 %v1384_v52 }
 0x1b9   :  { %513 = vmatprep.mubr.f32.mxu1 %v1394_v54 }
 0x1bc   :  { %514 = vmatmul.mubr.f32.gmra.mrb[66].mxu1 %v1410_v56 }
 0x1bd   :  { %518 = vmatprep.mubr.f32.mxu1 %v1420_v58  ;;  %v2495_v58 = vld [vmem:[#allocation65_spill] sm:$0xff] }
 0x1c0   :  { %519 = vmatmul.mubr.f32.gmra.mrb[68].mxu1 %v1434_v60 }
 0x1c1   :  { %523 = vmatprep.mubr.f32.mxu1 %v1444_v62 }
 0x1c4   :  { %524 = vmatmul.mubr.f32.gmra.mrb[70].mxu1 %v1458_v4  ;;  %v2492_v4 = vld [vmem:[#allocation64_spill] sm:$0xff] }
 0x1c5   :  { %528 = vmatprep.mubr.f32.mxu1 %v1468_v9 }
 0x1c8   :  { %529 = vmatmul.mubr.f32.gmra.mrb[72].mxu1 %v2465_v23 }
 0x1c9   :  { %533 = vmatprep.mubr.f32.mxu1 %v2466_v27  ;;  %v2477_v27 = vld [vmem:[#allocation52_spill] sm:$0xff] }
 0x1cc   :  { %534 = vmatmul.mubr.f32.gmra.mrb[74].mxu1 %v2467_v17  ;;  %v2478_v17 = vld [vmem:[#allocation53_spill] sm:$0xff] }
 0x1cd   :  { %538 = vmatprep.mubr.f32.mxu1 %v2468_v3  ;;  %v2479_v3 = vld [vmem:[#allocation54_spill] sm:$0xff] }
 0x1d0   :  { %539 = vmatmul.mubr.f32.gmra.mrb[76].mxu1 %v2469_v39  ;;  %v2480_v39 = vld [vmem:[#allocation55_spill] sm:$0xff] }
 0x1d1   :  { %543 = vmatprep.mubr.f32.mxu1 %v2470_v45  ;;  %v2481_v45 = vld [vmem:[#allocation56_spill] sm:$0xff] }
 0x1d4   :  { %544 = vmatmul.mubr.f32.gmra.mrb[78].mxu1 %v2471_v18  ;;  %v2482_v18 = vld [vmem:[#allocation57_spill] sm:$0xff] }
 0x1d5   :  { %548 = vmatprep.mubr.f32.mxu1 %v2472_v30  ;;  %v2483_v30 = vld [vmem:[#allocation58_spill] sm:$0xff] }
 0x1d8   :  { %549 = vmatmul.mubr.f32.gmra.mrb[80].mxu1 %v2473_v0  ;;  %v2484_v0 = vld [vmem:[#allocation59_spill] sm:$0xff] }
 0x1d9   :  { %553 = vmatprep.mubr.f32.mxu1 %v2474_v41  ;;  %v2485_v41 = vld [vmem:[#allocation60_spill] sm:$0xff] }
 0x1dc   :  { %554 = vmatmul.mubr.f32.gmra.mrb[82].mxu1 %v2475_v14  ;;  %v2486_v14 = vld [vmem:[#allocation61_spill] sm:$0xff] }
 0x1dd   :  { %558 = vmatprep.mubr.f32.mxu1 %v2476_v24  ;;  %v2487_v24 = vld [vmem:[#allocation62_spill] sm:$0xff] }
 0x1e0   :  { %559 = vmatmul.mubr.f32.gmra.mrb[84].mxu1 %v2477_v27  ;;  %v2488_v27 = vld [vmem:[#allocation2_spill] sm:$0xff] }
 0x1e1   :  { %563 = vmatprep.mubr.f32.mxu1 %v2478_v17  ;;  %v2489_v17 = vld [vmem:[#allocation63_spill] sm:$0xff] }
 0x1e2   :  { %v332_v23 = vadd.f32 %v2489_v17, %v2488_v27  ;;  %v2497_v17 = vld [vmem:[#allocation5_spill] sm:$0xff] }
 0x1e4   :  { %564 = vmatmul.mubr.f32.gmra.mrb[86].mxu1 %v2479_v3 }
 0x1e5   :  { %568 = vmatprep.mubr.f32.mxu1 %v2480_v39 }
 0x1e8   :  { %569 = vmatmul.mubr.f32.gmra.mrb[88].mxu1 %v2481_v45  ;;  %v2491_v45 = vld [vmem:[#allocation3_spill] sm:$0xff] }
 0x1e9   :  { %573 = vmatprep.mubr.f32.mxu1 %v2482_v18  ;;  %v333_v18 = vadd.f32 %v2492_v4, %v2491_v45 }
 0x1ec   :  { %574 = vmatmul.mubr.f32.gmra.mrb[90].mxu1 %v2483_v30 }
 0x1ed   :  { %578 = vmatprep.mubr.f32.mxu1 %v2484_v0 }
 0x1f0   :  { %579 = vmatmul.mubr.f32.gmra.mrb[92].mxu1 %v2485_v41  ;;  %v2494_v41 = vld [vmem:[#allocation4_spill] sm:$0xff] }
 0x1f1   :  { %583 = vmatprep.mubr.f32.mxu1 %v2486_v14  ;;  %v334_v14 = vadd.f32 %v2495_v58, %v2494_v41 }
 0x1f4   :  { %584 = vmatmul.mubr.f32.gmra.mrb[94].mxu1 %v2487_v24 }
 0x24b   :  { %v430_v3 = vpop.f32.mrb[32].mxu1 }
 0x24c   :  { %v1937_v9 = vadd.f32 %v430_v3, %v332_v23  ;;  %v432_v39 = vpop.f32.mrb[33].mxu1 }
 0x24d   :  { %v2498_v39 = vld [vmem:[#allocation66_spill] sm:$0xff] }
 0x24e   :  { %2490 = vst [vmem:[#allocation2_spill] sm:$0xff] %v1937_v9  ;;  %v335_v9 = vadd.f32 %v2498_v39, %v2497_v17 }
 0x24f   :  { %v435_v62 = vpop.f32.mrb[34].mxu1 }
 0x250   :  { %v1941_v30 = vadd.f32 %v435_v62, %v333_v18  ;;  %v1043_v0 = vpack.c.bf16 %v435_v62, %v430_v3  ;;  %v437_v60 = vpop.f32.mrb[35].mxu1  ;;  %v2500_v62 = vld [vmem:[#allocation6_spill] sm:$0xff] }
 0x251   :  { %v2501_v60 = vld [vmem:[#allocation67_spill] sm:$0xff] }
 0x252   :  { %2493 = vst [vmem:[#allocation63_spill] sm:$0xff] %v1941_v30  ;;  %1044 = vmatpush1.bf16.msra.mxu0 %v1043_v0  ;;  %v336_v3 = vadd.f32 %v2501_v60, %v2500_v62 }
 0x253   :  { %v440_v24 = vpop.f32.mrb[36].mxu1  ;;  %1045 = vmatprep.subr.bf16.mxu0 %v2444_v33 }
 0x254   :  { %v1946_v27 = vadd.f32 %v440_v24, %v334_v14  ;;  %v442_v23 = vpop.f32.mrb[37].mxu1  ;;  %v2503_v14 = vld [vmem:[#allocation7_spill] sm:$0xff] }
 0x255   :  { %v2504_v23 = vld [vmem:[#allocation68_spill] sm:$0xff] }
 0x256   :  { %2496 = vst [vmem:[#allocation3_spill] sm:$0xff] %v1946_v27  ;;  %v337_v27 = vadd.f32 %v2504_v23, %v2503_v14 }
 0x257   :  { %v445_v56 = vpop.f32.mrb[38].mxu1 }
 0x258   :  { %v1950_v4 = vadd.f32 %v445_v56, %v335_v9  ;;  %v1046_v45 = vpack.c.bf16 %v445_v56, %v440_v24  ;;  %v447_v18 = vpop.f32.mrb[39].mxu1  ;;  %v2506_v56 = vld [vmem:[#allocation8_spill] sm:$0xff]  ;;  %v2507_v24 = vld [vmem:[#allocation69_spill] sm:$0xff] }
 0x259   :  { %v338_v18 = vadd.f32 %v2507_v24, %v2506_v56 }
 0x25a   :  { %2499 = vst [vmem:[#allocation64_spill] sm:$0xff] %v1950_v4  ;;  %1047 = vmatpush1.bf16.msra.mxu0 %v1046_v45 }
 0x25b   :  { %v450_v58 = vpop.f32.mrb[40].mxu1  ;;  %1048 = vmatprep.subr.bf16.mxu0 %v2444_v33 }
 0x25c   :  { %v1955_v0 = vadd.f32 %v450_v58, %v336_v3  ;;  %v452_v41 = vpop.f32.mrb[41].mxu1  ;;  %v2509_v3 = vld [vmem:[#allocation9_spill] sm:$0xff] }
 0x25d   :  { %v2510_v41 = vld [vmem:[#allocation71_spill] sm:$0xff] }
 0x25e   :  { %2502 = vst [vmem:[#allocation4_spill] sm:$0xff] %v1955_v0  ;;  %v339_v0 = vadd.f32 %v2510_v41, %v2509_v3 }
 0x25f   :  { %v455_v30 = vpop.f32.mrb[42].mxu1 }
 0x260   :  { %v1959_v17 = vadd.f32 %v455_v30, %v337_v27  ;;  %v1049_v9 = vpack.c.bf16 %v455_v30, %v450_v58  ;;  %v457_v39 = vpop.f32.mrb[43].mxu1  ;;  %v2512_v30 = vld [vmem:[#allocation10_spill] sm:$0xff]  ;;  %v2513_v58 = vld [vmem:[#allocation73_spill] sm:$0xff] }
 0x261   :  { %v340_v39 = vadd.f32 %v2513_v58, %v2512_v30 }
 0x262   :  { %2505 = vst [vmem:[#allocation65_spill] sm:$0xff] %v1959_v17  ;;  %1050 = vmatpush1.bf16.msra.mxu0 %v1049_v9 }
 0x263   :  { %v460_v62 = vpop.f32.mrb[44].mxu1  ;;  %1051 = vmatprep.subr.bf16.mxu0 %v2444_v33 }
 0x264   :  { %v1964_v45 = vadd.f32 %v460_v62, %v338_v18  ;;  %v462_v60 = vpop.f32.mrb[45].mxu1  ;;  %v2515_v18 = vld [vmem:[#allocation11_spill] sm:$0xff] }
 0x265   :  { %v2516_v60 = vld [vmem:[#allocation75_spill] sm:$0xff] }
 0x266   :  { %2508 = vst [vmem:[#allocation5_spill] sm:$0xff] %v1964_v45  ;;  %v341_v45 = vadd.f32 %v2516_v60, %v2515_v18 }
 0x267   :  { %v465_v4 = vpop.f32.mrb[46].mxu1 }
 0x268   :  { %v1968_v14 = vadd.f32 %v465_v4, %v339_v0  ;;  %v1052_v27 = vpack.c.bf16 %v465_v4, %v460_v62  ;;  %v467_v23 = vpop.f32.mrb[47].mxu1  ;;  %v2517_v4 = vld [vmem:[#allocation12_spill] sm:$0xff]  ;;  %v2518_v62 = vld [vmem:[#allocation77_spill] sm:$0xff] }
 0x269   :  { %v342_v23 = vadd.f32 %v2518_v62, %v2517_v4  ;;  %v2523_v62 = vld [vmem:[#allocation15_spill] sm:$0xff] }
 0x26a   :  { %2511 = vst [vmem:[#allocation66_spill] sm:$0xff] %v1968_v14  ;;  %1053 = vmatpush1.bf16.msra.mxu0 %v1052_v27 }
 0x26b   :  { %v470_v56 = vpop.f32.mrb[48].mxu1  ;;  %1054 = vmatprep.subr.bf16.mxu0 %v2444_v33 }
 0x26c   :  { %v1973_v9 = vadd.f32 %v470_v56, %v340_v39  ;;  %v472_v24 = vpop.f32.mrb[49].mxu1  ;;  %v2520_v39 = vld [vmem:[#allocation13_spill] sm:$0xff] }
 0x26d   :  { %v2521_v24 = vld [vmem:[#allocation79_spill] sm:$0xff] }
 0x26e   :  { %2514 = vst [vmem:[#allocation6_spill] sm:$0xff] %v1973_v9  ;;  %v343_v9 = vadd.f32 %v2521_v24, %v2520_v39 }
 0x26f   :  { %v475_v17 = vpop.f32.mrb[50].mxu1 }
 0x270   :  { %v1977_v3 = vadd.f32 %v475_v17, %v341_v45  ;;  %v1055_v0 = vpack.c.bf16 %v475_v17, %v470_v56  ;;  %v477_v41 = vpop.f32.mrb[51].mxu1  ;;  %v2522_v17 = vld [vmem:[#allocation14_spill] sm:$0xff] }
 0x271   :  { %v344_v56 = vadd.f32 %v1829_v35, %v2522_v17  ;;  %v2526_v17 = vld [vmem:[#allocation17_spill] sm:$0xff] }
 0x272   :  { %1056 = vmatpush1.bf16.msra.mxu0 %v1055_v0 }
 0x273   :  { %v480_v30 = vpop.f32.mrb[52].mxu1  ;;  %1057 = vmatprep.subr.bf16.mxu0 %v2444_v33 }
 0x274   :  { %v1982_v27 = vadd.f32 %v480_v30, %v342_v23  ;;  %v482_v58 = vpop.f32.mrb[53].mxu1  ;;  %v2524_v23 = vld [vmem:[#allocation81_spill] sm:$0xff] }
 0x275   :  { %v345_v58 = vadd.f32 %v2524_v23, %v2523_v62 }
 0x276   :  { %2519 = vst [vmem:[#allocation67_spill] sm:$0xff] %v1982_v27 }
 0x277   :  { %v485_v14 = vpop.f32.mrb[54].mxu1 }
 0x278   :  { %v1986_v18 = vadd.f32 %v485_v14, %v343_v9  ;;  %v1058_v45 = vpack.c.bf16 %v485_v14, %v480_v30  ;;  %v487_v60 = vpop.f32.mrb[55].mxu1  ;;  %v2525_v14 = vld [vmem:[#allocation16_spill] sm:$0xff] }
 0x279   :  { %v346_v30 = vadd.f32 %v1842_v29, %v2525_v14  ;;  %v2528_v14 = vld [vmem:[#allocation19_spill] sm:$0xff] }
 0x27a   :  { %1059 = vmatpush1.bf16.msra.mxu0 %v1058_v45 }
 0x27b   :  { %v490_v41 = vpop.f32.mrb[56].mxu1  ;;  %1060 = vmatprep.subr.bf16.mxu0 %v2444_v33 }
 0x27c   :  { %v1991_v0 = vadd.f32 %v490_v41, %v344_v56  ;;  %v492_v4 = vpop.f32.mrb[57].mxu1  ;;  %v347_v56 = vadd.f32 %v1847_v47, %v2526_v17 }
 0x27f   :  { %v495_v27 = vpop.f32.mrb[58].mxu1 }
 0x280   :  { %v1995_v39 = vadd.f32 %v495_v27, %v345_v58  ;;  %v1061_v9 = vpack.c.bf16 %v495_v27, %v490_v41  ;;  %v497_v24 = vpop.f32.mrb[59].mxu1  ;;  %v2527_v27 = vld [vmem:[#allocation18_spill] sm:$0xff] }
 0x281   :  { %v348_v41 = vadd.f32 %v1754_v10, %v2527_v27  ;;  %v2530_v27 = vld [vmem:[#allocation21_spill] sm:$0xff] }
 0x282   :  { %1062 = vmatpush1.bf16.msra.mxu0 %v1061_v9 }
 0x283   :  { %v500_v35 = vpop.f32.mrb[60].mxu1  ;;  %1063 = vmatprep.subr.bf16.mxu0 %v2444_v33 }
 0x284   :  { %v2000_v45 = vadd.f32 %v500_v35, %v346_v30  ;;  %v502_v60 = vpop.f32.mrb[61].mxu1  ;;  %v349_v30 = vadd.f32 %v1758_v21, %v2528_v14 }
 0x287   :  { %v505_v4 = vpop.f32.mrb[62].mxu1 }
 0x288   :  { %v2004_v62 = vadd.f32 %v505_v4, %v347_v56  ;;  %v1064_v23 = vpack.c.bf16 %v505_v4, %v500_v35  ;;  %v507_v58 = vpop.f32.mrb[63].mxu1  ;;  %v2529_v35 = vld [vmem:[#allocation20_spill] sm:$0xff] }
 0x289   :  { %v350_v4 = vadd.f32 %v1767_v36, %v2529_v35  ;;  %v2534_v35 = vld [vmem:[#allocation23_spill] sm:$0xff] }
 0x28a   :  { %1065 = vmatpush1.bf16.msra.mxu0 %v1064_v23 }
 0x28b   :  { %v510_v29 = vpop.f32.mrb[64].mxu1  ;;  %1066 = vmatprep.subr.bf16.mxu0 %v2444_v33 }
 0x28c   :  { %v2009_v9 = vadd.f32 %v510_v29, %v348_v41  ;;  %v512_v24 = vpop.f32.mrb[65].mxu1  ;;  %v351_v41 = vadd.f32 %v1771_v42, %v2530_v27 }
 0x28f   :  { %v515_v60 = vpop.f32.mrb[66].mxu1 }
 0x290   :  { %v2013_v47 = vadd.f32 %v515_v60, %v349_v30  ;;  %v1067_v17 = vpack.c.bf16 %v515_v60, %v510_v29  ;;  %v517_v56 = vpop.f32.mrb[67].mxu1  ;;  %v2532_v29 = vld [vmem:[#allocation22_spill] sm:$0xff] }
 0x291   :  { %v352_v60 = vadd.f32 %v1780_v7, %v2532_v29 }
 0x292   :  { %1068 = vmatpush1.bf16.msra.mxu0 %v1067_v17 }
 0x293   :  { %v520_v10 = vpop.f32.mrb[68].mxu1  ;;  %1069 = vmatprep.subr.bf16.mxu0 %v2444_v33 }
 0x294   :  { %v2018_v23 = vadd.f32 %v520_v10, %v350_v4  ;;  %v522_v58 = vpop.f32.mrb[69].mxu1  ;;  %v353_v4 = vadd.f32 %v1784_v48, %v2534_v35 }
 0x297   :  { %v525_v24 = vpop.f32.mrb[70].mxu1 }
 0x298   :  { %v2022_v21 = vadd.f32 %v525_v24, %v351_v41  ;;  %v1070_v14 = vpack.c.bf16 %v525_v24, %v520_v10  ;;  %v527_v30 = vpop.f32.mrb[71].mxu1  ;;  %v2536_v10 = vld [vmem:[#allocation24_spill] sm:$0xff]  ;;  %v2537_v24 = vld [vmem:[#allocation70_spill] sm:$0xff] }
 0x299   :  { %v354_v30 = vadd.f32 %v2537_v24, %v2536_v10 }
 0x29a   :  { %2531 = vst [vmem:[#allocation7_spill] sm:$0xff] %v2022_v21  ;;  %1071 = vmatpush1.bf16.msra.mxu0 %v1070_v14 }
 0x29b   :  { %v530_v36 = vpop.f32.mrb[72].mxu1  ;;  %1072 = vmatprep.subr.bf16.mxu0 %v2444_v33 }
 0x29c   :  { %v2027_v17 = vadd.f32 %v530_v36, %v352_v60  ;;  %v532_v56 = vpop.f32.mrb[73].mxu1  ;;  %v2539_v60 = vld [vmem:[#allocation25_spill] sm:$0xff] }
 0x29d   :  { %v2540_v56 = vld [vmem:[#allocation72_spill] sm:$0xff] }
 0x29e   :  { %2533 = vst [vmem:[#allocation68_spill] sm:$0xff] %v2027_v17  ;;  %v355_v17 = vadd.f32 %v2540_v56, %v2539_v60 }
 0x29f   :  { %v535_v58 = vpop.f32.mrb[74].mxu1 }
 0x2a0   :  { %v2031_v42 = vadd.f32 %v535_v58, %v353_v4  ;;  %v1073_v27 = vpack.c.bf16 %v535_v58, %v530_v36  ;;  %v537_v41 = vpop.f32.mrb[75].mxu1  ;;  %v2542_v36 = vld [vmem:[#allocation26_spill] sm:$0xff] }
 0x2a1   :  { %v2543_v58 = vld [vmem:[#allocation74_spill] sm:$0xff] }
 0x2a2   :  { %2535 = vst [vmem:[#allocation8_spill] sm:$0xff] %v2031_v42  ;;  %1074 = vmatpush1.bf16.msra.mxu0 %v1073_v27  ;;  %v356_v41 = vadd.f32 %v2543_v58, %v2542_v36 }
 0x2a3   :  { %v540_v7 = vpop.f32.mrb[76].mxu1  ;;  %1075 = vmatprep.subr.bf16.mxu0 %v2444_v33 }
 0x2a4   :  { %v2036_v14 = vadd.f32 %v540_v7, %v354_v30  ;;  %v542_v29 = vpop.f32.mrb[77].mxu1  ;;  %v2545_v30 = vld [vmem:[#allocation27_spill] sm:$0xff] }
 0x2a5   :  { %v2546_v29 = vld [vmem:[#allocation76_spill] sm:$0xff] }
 0x2a6   :  { %2538 = vst [vmem:[#allocation69_spill] sm:$0xff] %v2036_v14  ;;  %v357_v14 = vadd.f32 %v2546_v29, %v2545_v30 }
 0x2a7   :  { %v545_v21 = vpop.f32.mrb[78].mxu1 }
 0x2a8   :  { %v2040_v48 = vadd.f32 %v545_v21, %v355_v17  ;;  %v1076_v35 = vpack.c.bf16 %v545_v21, %v540_v7  ;;  %v547_v4 = vpop.f32.mrb[79].mxu1  ;;  %v2547_v21 = vld [vmem:[#allocation28_spill] sm:$0xff]  ;;  %v2548_v7 = vld [vmem:[#allocation78_spill] sm:$0xff] }
 0x2a9   :  { %v358_v4 = vadd.f32 %v2548_v7, %v2547_v21  ;;  %v2553_v7 = vld [vmem:[#allocation31_spill] sm:$0xff] }
 0x2aa   :  { %2541 = vst [vmem:[#allocation9_spill] sm:$0xff] %v2040_v48  ;;  %1077 = vmatpush1.bf16.msra.mxu0 %v1076_v35 }
 0x2ab   :  { %v550_v10 = vpop.f32.mrb[80].mxu1  ;;  %1078 = vmatprep.subr.bf16.mxu0 %v2444_v33 }
 0x2ac   :  { %v2045_v27 = vadd.f32 %v550_v10, %v356_v41  ;;  %v552_v24 = vpop.f32.mrb[81].mxu1  ;;  %v2550_v41 = vld [vmem:[#allocation29_spill] sm:$0xff] }
 0x2ad   :  { %v2551_v24 = vld [vmem:[#allocation80_spill] sm:$0xff] }
 0x2ae   :  { %2544 = vst [vmem:[#allocation71_spill] sm:$0xff] %v2045_v27  ;;  %v359_v27 = vadd.f32 %v2551_v24, %v2550_v41 }
 0x2af   :  { %v555_v42 = vpop.f32.mrb[82].mxu1 }
 0x2b0   :  { %v2049_v60 = vadd.f32 %v555_v42, %v357_v14  ;;  %v1079_v17 = vpack.c.bf16 %v555_v42, %v550_v10  ;;  %v557_v56 = vpop.f32.mrb[83].mxu1  ;;  %v2552_v42 = vld [vmem:[#allocation30_spill] sm:$0xff] }
 0x2b1   :  { %v360_v10 = vadd.f32 %v1832_v1, %v2552_v42  ;;  %v2556_v42 = vld [vmem:[#allocation33_spill] sm:$0xff] }
 0x2b2   :  { %1080 = vmatpush1.bf16.msra.mxu0 %v1079_v17 }
 0x2b3   :  { %v560_v36 = vpop.f32.mrb[84].mxu1  ;;  %1081 = vmatprep.subr.bf16.mxu0 %v2444_v33 }
 0x2b4   :  { %v2054_v35 = vadd.f32 %v560_v36, %v358_v4  ;;  %v562_v58 = vpop.f32.mrb[85].mxu1  ;;  %v2554_v4 = vld [vmem:[#allocation82_spill] sm:$0xff] }
 0x2b5   :  { %v361_v58 = vadd.f32 %v2554_v4, %v2553_v7 }
 0x2b6   :  { %2549 = vst [vmem:[#allocation10_spill] sm:$0xff] %v2054_v35 }
 0x2b7   :  { %v565_v48 = vpop.f32.mrb[86].mxu1 }
 0x2b8   :  { %v2058_v30 = vadd.f32 %v565_v48, %v359_v27  ;;  %v1082_v14 = vpack.c.bf16 %v565_v48, %v560_v36  ;;  %v567_v29 = vpop.f32.mrb[87].mxu1  ;;  %v2555_v48 = vld [vmem:[#allocation32_spill] sm:$0xff] }
 0x2b9   :  { %v362_v36 = vadd.f32 %v1845_v12, %v2555_v48 }
 0x2ba   :  { %1083 = vmatpush1.bf16.msra.mxu0 %v1082_v14 }
 0x2bb   :  { %v570_v56 = vpop.f32.mrb[88].mxu1  ;;  %1084 = vmatprep.subr.bf16.mxu0 %v2444_v33 }
 0x2bc   :  { %v2063_v17 = vadd.f32 %v570_v56, %v360_v10  ;;  %v572_v21 = vpop.f32.mrb[89].mxu1  ;;  %v363_v10 = vadd.f32 %v1849_v16, %v2556_v42  ;;  %v2584_v16 = vld [vmem:[#allocation61_spill] sm:$0xff] }
 0x2bf   :  { %v575_v35 = vpop.f32.mrb[90].mxu1 }
 0x2c0   :  { %v2067_v41 = vadd.f32 %v575_v35, %v361_v58  ;;  %v1085_v27 = vpack.c.bf16 %v575_v35, %v570_v56  ;;  %v577_v24 = vpop.f32.mrb[91].mxu1  ;;  %v2587_v35 = vld [vmem:[#allocation63_spill] sm:$0xff] }
 0x2c2   :  { %1086 = vmatpush1.bf16.msra.mxu0 %v1085_v27 }
 0x2c3   :  { %v580_v1 = vpop.f32.mrb[92].mxu1  ;;  %1087 = vmatprep.subr.bf16.mxu0 %v2444_v33  ;;  %v2566_v33 = vld [vmem:[#allocation43_spill] sm:$0xff] }
 0x2c4   :  { %v2072_v14 = vadd.f32 %v580_v1, %v362_v36  ;;  %v582_v29 = vpop.f32.mrb[93].mxu1  ;;  %v2588_v36 = vld [vmem:[#allocation3_spill] sm:$0xff] }
 0x2c7   :  { %v585_v21 = vpop.f32.mrb[94].mxu1 }
 0x2c8   :  { %v2076_v7 = vadd.f32 %v585_v21, %v363_v10  ;;  %v1088_v4 = vpack.c.bf16 %v585_v21, %v580_v1  ;;  %v587_v58 = vpop.f32.mrb[95].mxu1  ;;  %v2589_v21 = vld [vmem:[#allocation64_spill] sm:$0xff] }
 0x2ca   :  { %1089 = vmatpush1.bf16.msra.mxu0 %v1088_v4 }
 0x2cd   :  { %686 = vmatmul.mubr.f32.vlgmr.msra.gmra.mrb[32].mxu0 %v1379_v51  ;;  %v2573_v51 = vld [vmem:[#allocation50_spill] sm:$0xff] }
 0x2ce   :  { %690 = vmatprep.mubr.f32.mxu0 %v1389_v53  ;;  %v2575_v53 = vld [vmem:[#allocation52_spill] sm:$0xff] }
 0x2d1   :  { %691 = vmatmul.mubr.f32.gmra.mrb[34].mxu0 %v1404_v55  ;;  %v2577_v55 = vld [vmem:[#allocation54_spill] sm:$0xff] }
 0x2d2   :  { %695 = vmatprep.mubr.f32.mxu0 %v1415_v57  ;;  %v2578_v57 = vld [vmem:[#allocation55_spill] sm:$0xff] }
 0x2d5   :  { %696 = vmatmul.mubr.f32.gmra.mrb[36].mxu0 %v1428_v59  ;;  %v2579_v59 = vld [vmem:[#allocation56_spill] sm:$0xff] }
 0x2d6   :  { %700 = vmatprep.mubr.f32.mxu0 %v1439_v61  ;;  %v2580_v61 = vld [vmem:[#allocation57_spill] sm:$0xff] }
 0x2d9   :  { %701 = vmatmul.mubr.f32.gmra.mrb[38].mxu0 %v1452_v63  ;;  %v2581_v63 = vld [vmem:[#allocation58_spill] sm:$0xff] }
 0x2da   :  { %705 = vmatprep.mubr.f32.mxu0 %v1463_v6  ;;  %v2582_v6 = vld [vmem:[#allocation59_spill] sm:$0xff] }
 0x2dd   :  { %706 = vmatmul.mubr.f32.gmra.mrb[40].mxu0 %v1476_v13  ;;  %v2583_v13 = vld [vmem:[#allocation60_spill] sm:$0xff] }
 0x2de   :  { %710 = vmatprep.mubr.f32.mxu0 %v1487_v20  ;;  %v2585_v20 = vld [vmem:[#allocation62_spill] sm:$0xff] }
 0x2e1   :  { %711 = vmatmul.mubr.f32.gmra.mrb[42].mxu0 %v1500_v26 }
 0x2e2   :  { %715 = vmatprep.mubr.f32.mxu0 %v1511_v32  ;;  %v2586_v32 = vld [vmem:[#allocation2_spill] sm:$0xff] }
 0x2e5   :  { %716 = vmatmul.mubr.f32.gmra.mrb[44].mxu0 %v1524_v38 }
 0x2e6   :  { %720 = vmatprep.mubr.f32.mxu0 %v1535_v44 }
 0x2e9   :  { %721 = vmatmul.mubr.f32.gmra.mrb[46].mxu0 %v1548_v50 }
 0x2ea   :  { %725 = vmatprep.mubr.f32.mxu0 %v1559_v49  ;;  %v2572_v49 = vld [vmem:[#allocation49_spill] sm:$0xff] }
 0x2ed   :  { %726 = vmatmul.mubr.f32.gmra.mrb[48].mxu0 %v1572_v46  ;;  %v2571_v46 = vld [vmem:[#allocation48_spill] sm:$0xff] }
 0x2ee   :  { %730 = vmatprep.mubr.f32.mxu0 %v1583_v43  ;;  %v2570_v43 = vld [vmem:[#allocation47_spill] sm:$0xff] }
 0x2f1   :  { %731 = vmatmul.mubr.f32.gmra.mrb[50].mxu0 %v1596_v40  ;;  %v2569_v40 = vld [vmem:[#allocation46_spill] sm:$0xff] }
 0x2f2   :  { %735 = vmatprep.mubr.f32.mxu0 %v1607_v37  ;;  %v2568_v37 = vld [vmem:[#allocation45_spill] sm:$0xff] }
 0x2f5   :  { %736 = vmatmul.mubr.f32.gmra.mrb[52].mxu0 %v1620_v34  ;;  %v2567_v34 = vld [vmem:[#allocation44_spill] sm:$0xff] }
 0x2f6   :  { %740 = vmatprep.mubr.f32.mxu0 %v1631_v31  ;;  %v2565_v31 = vld [vmem:[#allocation42_spill] sm:$0xff] }
 0x2f9   :  { %741 = vmatmul.mubr.f32.gmra.mrb[54].mxu0 %v1644_v28  ;;  %v1123_v28 = vld [vmem:[%s2272_s0 + $0x108] sm:$0xff] }
 0x2fa   :  { %745 = vmatprep.mubr.f32.mxu0 %v1655_v25  ;;  %v2564_v25 = vld [vmem:[#allocation41_spill] sm:$0xff] }
 0x2fd   :  { %746 = vmatmul.mubr.f32.gmra.mrb[56].mxu0 %v1668_v22  ;;  %v2563_v22 = vld [vmem:[#allocation40_spill] sm:$0xff] }
 0x2fe   :  { %750 = vmatprep.mubr.f32.mxu0 %v1679_v19  ;;  %v2557_v19 = vld [vmem:[#allocation34_spill] sm:$0xff] }
 0x301   :  { %751 = vmatmul.mubr.f32.gmra.mrb[58].mxu0 %v1692_v15  ;;  %v2558_v15 = vld [vmem:[#allocation35_spill] sm:$0xff] }
 0x302   :  { %755 = vmatprep.mubr.f32.mxu0 %v1703_v11  ;;  %v2559_v11 = vld [vmem:[#allocation36_spill] sm:$0xff] }
 0x305   :  { %756 = vmatmul.mubr.f32.gmra.mrb[60].mxu0 %v1716_v8  ;;  %v2560_v8 = vld [vmem:[#allocation37_spill] sm:$0xff] }
 0x306   :  { %760 = vmatprep.mubr.f32.mxu0 %v1727_v5  ;;  %v2561_v5 = vld [vmem:[#allocation38_spill] sm:$0xff] }
 0x309   :  { %761 = vmatmul.mubr.f32.gmra.mrb[62].mxu0 %v1740_v2  ;;  %v2562_v2 = vld [vmem:[#allocation39_spill] sm:$0xff] }
 0x30a   :  { %765 = vmatprep.mubr.f32.mxu0 %v1123_v28 }
 0x30d   :  { %766 = vmatmul.mubr.f32.gmra.mrb[64].mxu0 %v1384_v52  ;;  %v2574_v52 = vld [vmem:[#allocation51_spill] sm:$0xff] }
 0x30e   :  { %770 = vmatprep.mubr.f32.mxu0 %v1394_v54  ;;  %v2576_v54 = vld [vmem:[#allocation53_spill] sm:$0xff] }
 0x311   :  { %771 = vmatmul.mubr.f32.gmra.mrb[66].mxu0 %v2557_v19 }
 0x312   :  { %775 = vmatprep.mubr.f32.mxu0 %v2558_v15  ;;  %v2590_v15 = vld [vmem:[#allocation4_spill] sm:$0xff] }
 0x315   :  { %776 = vmatmul.mubr.f32.gmra.mrb[68].mxu0 %v2559_v11 }
 0x316   :  { %780 = vmatprep.mubr.f32.mxu0 %v2560_v8 }
 0x319   :  { %781 = vmatmul.mubr.f32.gmra.mrb[70].mxu0 %v2561_v5 }
 0x31a   :  { %785 = vmatprep.mubr.f32.mxu0 %v2562_v2 }
 0x31d   :  { %786 = vmatmul.mubr.f32.gmra.mrb[72].mxu0 %v2563_v22  ;;  %v2591_v22 = vld [vmem:[#allocation65_spill] sm:$0xff] }
 0x31e   :  { %790 = vmatprep.mubr.f32.mxu0 %v2564_v25 }
 0x321   :  { %791 = vmatmul.mubr.f32.gmra.mrb[74].mxu0 %v2565_v31 }
 0x322   :  { %795 = vmatprep.mubr.f32.mxu0 %v2566_v33 }
 0x325   :  { %796 = vmatmul.mubr.f32.gmra.mrb[76].mxu0 %v2567_v34 }
 0x326   :  { %800 = vmatprep.mubr.f32.mxu0 %v2568_v37  ;;  %v2592_v37 = vld [vmem:[#allocation5_spill] sm:$0xff] }
 0x329   :  { %801 = vmatmul.mubr.f32.gmra.mrb[78].mxu0 %v2569_v40 }
 0x32a   :  { %805 = vmatprep.mubr.f32.mxu0 %v2570_v43 }
 0x32d   :  { %806 = vmatmul.mubr.f32.gmra.mrb[80].mxu0 %v2571_v46 }
 0x32e   :  { %810 = vmatprep.mubr.f32.mxu0 %v2572_v49 }
 0x331   :  { %811 = vmatmul.mubr.f32.gmra.mrb[82].mxu0 %v2573_v51  ;;  %v2593_v51 = vld [vmem:[#allocation66_spill] sm:$0xff] }
 0x332   :  { %815 = vmatprep.mubr.f32.mxu0 %v2574_v52 }
 0x335   :  { %816 = vmatmul.mubr.f32.gmra.mrb[84].mxu0 %v2575_v53 }
 0x336   :  { %820 = vmatprep.mubr.f32.mxu0 %v2576_v54 }
 0x339   :  { %821 = vmatmul.mubr.f32.gmra.mrb[86].mxu0 %v2577_v55 }
 0x33a   :  { %825 = vmatprep.mubr.f32.mxu0 %v2578_v57  ;;  %v2594_v57 = vld [vmem:[#allocation6_spill] sm:$0xff] }
 0x33d   :  { %826 = vmatmul.mubr.f32.gmra.mrb[88].mxu0 %v2579_v59 }
 0x33e   :  { %830 = vmatprep.mubr.f32.mxu0 %v2580_v61 }
 0x341   :  { %831 = vmatmul.mubr.f32.gmra.mrb[90].mxu0 %v2581_v63 }
 0x342   :  { %835 = vmatprep.mubr.f32.mxu0 %v2582_v6 }
 0x345   :  { %836 = vmatmul.mubr.f32.gmra.mrb[92].mxu0 %v2583_v13 }
 0x346   :  { %840 = vmatprep.mubr.f32.mxu0 %v2584_v16 }
 0x349   :  { %841 = vmatmul.mubr.f32.gmra.mrb[94].mxu0 %v2585_v20 }
 0x3a0   :  { %v687_v26 = vpop.f32.mrb[32].mxu0 }
 0x3a1   :  { %v846_v38 = vadd.f32 %v687_v26, %v2586_v32  ;;  %v689_v44 = vpop.f32.mrb[33].mxu0  ;;  %v2595_v32 = vld [vmem:[#allocation67_spill] sm:$0xff] }
 0x3a3   :  { %v878_v50 = vmul.f32 0.25, %v846_v38 }
 0x3a4   :  { %v692_v12 = vpop.f32.mrb[34].mxu0 }
 0x3a5   :  { %910 = vst [vmem:[%s2273_s2] sm:$0xff] %v878_v50  ;;  %v847_v56 = vadd.f32 %v692_v12, %v2587_v35  ;;  %v694_v27 = vpop.f32.mrb[35].mxu0 }
 0x3a7   :  { %v879_v24 = vmul.f32 0.25, %v847_v56 }
 0x3a8   :  { %v697_v48 = vpop.f32.mrb[36].mxu0 }
 0x3a9   :  { %911 = vst [vmem:[%s2273_s2 + $0x8] sm:$0xff] %v879_v24  ;;  %v848_v1 = vadd.f32 %v697_v48, %v2588_v36  ;;  %v699_v29 = vpop.f32.mrb[37].mxu0 }
 0x3ab   :  { %v880_v42 = vmul.f32 0.25, %v848_v1 }
 0x3ac   :  { %v702_v10 = vpop.f32.mrb[38].mxu0 }
 0x3ad   :  { %912 = vst [vmem:[%s2273_s2 + $0x10] sm:$0xff] %v880_v42  ;;  %v849_v4 = vadd.f32 %v702_v10, %v2589_v21  ;;  %v704_v58 = vpop.f32.mrb[39].mxu0 }
 0x3af   :  { %v881_v28 = vmul.f32 0.25, %v849_v4 }
 0x3b0   :  { %v707_v19 = vpop.f32.mrb[40].mxu0 }
 0x3b1   :  { %913 = vst [vmem:[%s2273_s2 + $0x18] sm:$0xff] %v881_v28  ;;  %v850_v11 = vadd.f32 %v707_v19, %v2590_v15  ;;  %v709_v8 = vpop.f32.mrb[41].mxu0 }
 0x3b3   :  { %v882_v5 = vmul.f32 0.25, %v850_v11 }
 0x3b4   :  { %v712_v2 = vpop.f32.mrb[42].mxu0 }
 0x3b5   :  { %914 = vst [vmem:[%s2273_s2 + $0x20] sm:$0xff] %v882_v5  ;;  %v851_v25 = vadd.f32 %v712_v2, %v2591_v22  ;;  %v714_v31 = vpop.f32.mrb[43].mxu0 }
 0x3b7   :  { %v883_v33 = vmul.f32 0.25, %v851_v25 }
 0x3b8   :  { %v717_v34 = vpop.f32.mrb[44].mxu0 }
 0x3b9   :  { %915 = vst [vmem:[%s2273_s2 + $0x28] sm:$0xff] %v883_v33  ;;  %v852_v40 = vadd.f32 %v717_v34, %v2592_v37  ;;  %v719_v43 = vpop.f32.mrb[45].mxu0  ;;  %v2596_v37 = vld [vmem:[#allocation7_spill] sm:$0xff] }
 0x3bb   :  { %v884_v46 = vmul.f32 0.25, %v852_v40 }
 0x3bc   :  { %v722_v49 = vpop.f32.mrb[46].mxu0 }
 0x3bd   :  { %916 = vst [vmem:[%s2273_s2 + $0x30] sm:$0xff] %v884_v46  ;;  %v853_v52 = vadd.f32 %v722_v49, %v2593_v51  ;;  %v724_v53 = vpop.f32.mrb[47].mxu0  ;;  %v2597_v49 = vld [vmem:[#allocation68_spill] sm:$0xff] }
 0x3bf   :  { %v885_v54 = vmul.f32 0.25, %v853_v52 }
 0x3c0   :  { %v727_v55 = vpop.f32.mrb[48].mxu0 }
 0x3c1   :  { %917 = vst [vmem:[%s2273_s2 + $0x38] sm:$0xff] %v885_v54  ;;  %v854_v59 = vadd.f32 %v727_v55, %v2594_v57  ;;  %v729_v61 = vpop.f32.mrb[49].mxu0  ;;  %v2598_v54 = vld [vmem:[#allocation8_spill] sm:$0xff] }
 0x3c3   :  { %v886_v63 = vmul.f32 0.25, %v854_v59 }
 0x3c4   :  { %v732_v6 = vpop.f32.mrb[50].mxu0 }
 0x3c5   :  { %918 = vst [vmem:[%s2273_s2 + $0x40] sm:$0xff] %v886_v63  ;;  %v855_v13 = vadd.f32 %v732_v6, %v1977_v3  ;;  %v734_v16 = vpop.f32.mrb[51].mxu0  ;;  %v2599_v63 = vld [vmem:[#allocation69_spill] sm:$0xff] }
 0x3c7   :  { %v887_v20 = vmul.f32 0.25, %v855_v13 }
 0x3c8   :  { %v737_v26 = vpop.f32.mrb[52].mxu0 }
 0x3c9   :  { %919 = vst [vmem:[%s2273_s2 + $0x48] sm:$0xff] %v887_v20  ;;  %v856_v38 = vadd.f32 %v737_v26, %v2595_v32  ;;  %v739_v44 = vpop.f32.mrb[53].mxu0  ;;  %v2600_v26 = vld [vmem:[#allocation9_spill] sm:$0xff] }
 0x3cb   :  { %v888_v50 = vmul.f32 0.25, %v856_v38 }
 0x3cc   :  { %v742_v12 = vpop.f32.mrb[54].mxu0 }
 0x3cd   :  { %920 = vst [vmem:[%s2273_s2 + $0x50] sm:$0xff] %v888_v50  ;;  %v857_v35 = vadd.f32 %v742_v12, %v1986_v18  ;;  %v744_v56 = vpop.f32.mrb[55].mxu0  ;;  %v2601_v12 = vld [vmem:[#allocation71_spill] sm:$0xff] }
 0x3cf   :  { %v889_v3 = vmul.f32 0.25, %v857_v35 }
 0x3d0   :  { %v747_v27 = vpop.f32.mrb[56].mxu0 }
 0x3d1   :  { %921 = vst [vmem:[%s2273_s2 + $0x58] sm:$0xff] %v889_v3  ;;  %v858_v24 = vadd.f32 %v747_v27, %v1991_v0  ;;  %v749_v48 = vpop.f32.mrb[57].mxu0 }
 0x3d3   :  { %v890_v36 = vmul.f32 0.25, %v858_v24 }
 0x3d4   :  { %v752_v1 = vpop.f32.mrb[58].mxu0 }
 0x3d5   :  { %922 = vst [vmem:[%s2273_s2 + $0x60] sm:$0xff] %v890_v36  ;;  %v859_v29 = vadd.f32 %v752_v1, %v1995_v39  ;;  %v754_v42 = vpop.f32.mrb[59].mxu0 }
 0x3d7   :  { %v891_v18 = vmul.f32 0.25, %v859_v29  ;;  %v2602_v29 = vld [vmem:[#allocation10_spill] sm:$0xff] }
 0x3d8   :  { %v757_v10 = vpop.f32.mrb[60].mxu0 }
 0x3d9   :  { %923 = vst [vmem:[%s2273_s2 + $0x68] sm:$0xff] %v891_v18  ;;  %v860_v21 = vadd.f32 %v757_v10, %v2000_v45  ;;  %v759_v4 = vpop.f32.mrb[61].mxu0 }
 0x3db   :  { %v892_v0 = vmul.f32 0.25, %v860_v21 }
 0x3dc   :  { %v762_v58 = vpop.f32.mrb[62].mxu0 }
 0x3dd   :  { %924 = vst [vmem:[%s2273_s2 + $0x70] sm:$0xff] %v892_v0  ;;  %v861_v28 = vadd.f32 %v762_v58, %v2004_v62  ;;  %v764_v19 = vpop.f32.mrb[63].mxu0 }
 0x3df   :  { %v893_v39 = vmul.f32 0.25, %v861_v28 }
 0x3e0   :  { %v767_v15 = vpop.f32.mrb[64].mxu0 }
 0x3e1   :  { %925 = vst [vmem:[%s2273_s2 + $0x78] sm:$0xff] %v893_v39  ;;  %v862_v11 = vadd.f32 %v767_v15, %v2009_v9  ;;  %v769_v8 = vpop.f32.mrb[65].mxu0 }
 0x3e3   :  { %v894_v45 = vmul.f32 0.25, %v862_v11 }
 0x3e4   :  { %v772_v5 = vpop.f32.mrb[66].mxu0 }
 0x3e5   :  { %926 = vst [vmem:[%s2273_s2 + $0x80] sm:$0xff] %v894_v45  ;;  %v863_v2 = vadd.f32 %v772_v5, %v2013_v47  ;;  %v774_v22 = vpop.f32.mrb[67].mxu0 }
 0x3e7   :  { %v895_v62 = vmul.f32 0.25, %v863_v2 }
 0x3e8   :  { %v777_v25 = vpop.f32.mrb[68].mxu0 }
 0x3e9   :  { %927 = vst [vmem:[%s2273_s2 + $0x88] sm:$0xff] %v895_v62  ;;  %v864_v31 = vadd.f32 %v777_v25, %v2018_v23  ;;  %v779_v33 = vpop.f32.mrb[69].mxu0 }
 0x3eb   :  { %v896_v9 = vmul.f32 0.25, %v864_v31 }
 0x3ec   :  { %v782_v34 = vpop.f32.mrb[70].mxu0 }
 0x3ed   :  { %928 = vst [vmem:[%s2273_s2 + $0x90] sm:$0xff] %v896_v9  ;;  %v865_v40 = vadd.f32 %v782_v34, %v2596_v37  ;;  %v784_v43 = vpop.f32.mrb[71].mxu0 }
 0x3ef   :  { %v897_v47 = vmul.f32 0.25, %v865_v40 }
 0x3f0   :  { %v787_v46 = vpop.f32.mrb[72].mxu0 }
 0x3f1   :  { %929 = vst [vmem:[%s2273_s2 + $0x98] sm:$0xff] %v897_v47  ;;  %v866_v51 = vadd.f32 %v787_v46, %v2597_v49  ;;  %v789_v52 = vpop.f32.mrb[73].mxu0 }
 0x3f3   :  { %v898_v23 = vmul.f32 0.25, %v866_v51 }
 0x3f4   :  { %v792_v53 = vpop.f32.mrb[74].mxu0 }
 0x3f5   :  { %930 = vst [vmem:[%s2273_s2 + $0xa0] sm:$0xff] %v898_v23  ;;  %v867_v55 = vadd.f32 %v792_v53, %v2598_v54  ;;  %v794_v57 = vpop.f32.mrb[75].mxu0 }
 0x3f7   :  { %v899_v59 = vmul.f32 0.25, %v867_v55 }
 0x3f8   :  { %v797_v61 = vpop.f32.mrb[76].mxu0 }
 0x3f9   :  { %931 = vst [vmem:[%s2273_s2 + $0xa8] sm:$0xff] %v899_v59  ;;  %v868_v6 = vadd.f32 %v797_v61, %v2599_v63  ;;  %v799_v13 = vpop.f32.mrb[77].mxu0 }
 0x3fb   :  { %v900_v16 = vmul.f32 0.25, %v868_v6 }
 0x3fc   :  { %v802_v20 = vpop.f32.mrb[78].mxu0 }
 0x3fd   :  { %932 = vst [vmem:[%s2273_s2 + $0xb0] sm:$0xff] %v900_v16  ;;  %v869_v32 = vadd.f32 %v802_v20, %v2600_v26  ;;  %v804_v38 = vpop.f32.mrb[79].mxu0 }
 0x3ff   :  { %v901_v44 = vmul.f32 0.25, %v869_v32 }
 0x400   :  { %v807_v50 = vpop.f32.mrb[80].mxu0 }
 0x401   :  { %933 = vst [vmem:[%s2273_s2 + $0xb8] sm:$0xff] %v901_v44  ;;  %v870_v35 = vadd.f32 %v807_v50, %v2601_v12  ;;  %v809_v56 = vpop.f32.mrb[81].mxu0 }
 0x403   :  { %v902_v3 = vmul.f32 0.25, %v870_v35 }
 0x404   :  { %v812_v27 = vpop.f32.mrb[82].mxu0 }
 0x405   :  { %934 = vst [vmem:[%s2273_s2 + $0xc0] sm:$0xff] %v902_v3  ;;  %v871_v24 = vadd.f32 %v812_v27, %v2049_v60  ;;  %v814_v48 = vpop.f32.mrb[83].mxu0 }
 0x407   :  { %v903_v36 = vmul.f32 0.25, %v871_v24 }
 0x408   :  { %v817_v1 = vpop.f32.mrb[84].mxu0 }
 0x409   :  { %935 = vst [vmem:[%s2273_s2 + $0xc8] sm:$0xff] %v903_v36  ;;  %v872_v42 = vadd.f32 %v817_v1, %v2602_v29  ;;  %v819_v18 = vpop.f32.mrb[85].mxu0 }
 0x40b   :  { %v904_v10 = vmul.f32 0.25, %v872_v42 }
 0x40c   :  { %v822_v21 = vpop.f32.mrb[86].mxu0 }
 0x40d   :  { %936 = vst [vmem:[%s2273_s2 + $0xd0] sm:$0xff] %v904_v10  ;;  %v873_v4 = vadd.f32 %v822_v21, %v2058_v30  ;;  %v824_v0 = vpop.f32.mrb[87].mxu0 }
 0x40f   :  { %v905_v60 = vmul.f32 0.25, %v873_v4 }
 0x410   :  { %v827_v58 = vpop.f32.mrb[88].mxu0 }
 0x411   :  { %937 = vst [vmem:[%s2273_s2 + $0xd8] sm:$0xff] %v905_v60  ;;  %v874_v28 = vadd.f32 %v827_v58, %v2063_v17  ;;  %v829_v19 = vpop.f32.mrb[89].mxu0 }
 0x413   :  { %v906_v39 = vmul.f32 0.25, %v874_v28 }
 0x414   :  { %v832_v15 = vpop.f32.mrb[90].mxu0 }
 0x415   :  { %938 = vst [vmem:[%s2273_s2 + $0xe0] sm:$0xff] %v906_v39  ;;  %v875_v11 = vadd.f32 %v832_v15, %v2067_v41  ;;  %v834_v8 = vpop.f32.mrb[91].mxu0 }
 0x417   :  { %v907_v30 = vmul.f32 0.25, %v875_v11 }
 0x418   :  { %v837_v45 = vpop.f32.mrb[92].mxu0 }
 0x419   :  { %939 = vst [vmem:[%s2273_s2 + $0xe8] sm:$0xff] %v907_v30  ;;  %v876_v5 = vadd.f32 %v837_v45, %v2072_v14  ;;  %v839_v2 = vpop.f32.mrb[93].mxu0 }
 0x41b   :  { %v908_v17 = vmul.f32 0.25, %v876_v5 }
 0x41c   :  { %v842_v22 = vpop.f32.mrb[94].mxu0 }
 0x41d   :  { %940 = vst [vmem:[%s2273_s2 + $0xf0] sm:$0xff] %v908_v17  ;;  %v877_v62 = vadd.f32 %v842_v22, %v2076_v7  ;;  %v844_v25 = vpop.f32.mrb[95].mxu0 }
 0x41f   :  { %v909_v41 = vmul.f32 0.25, %v877_v62 }
 0x421   :  { %941 = vst [vmem:[%s2273_s2 + $0xf8] sm:$0xff] %v909_v41 }

</bundles_post_ra>
